<compile_context>
chip_gen: v7x
topology: tpu7x:2x2x1
jax: 0.10.0
libtpu: 0.0.40
codegen_flags: <defaults>
</compile_context>

<pallas_src>
import jax
import jax.numpy as jnp
from jax.experimental import pallas as pl
from jax.experimental.pallas import tpu as pltpu


def _round_up(x, m):
    return ((x + m - 1) // m) * m


def _cdiv(a, b):
    return (a + b - 1) // b


def _vmem_capacity_bytes():
    """Per-core VMEM capacity; conservative 64 MiB default if the query fails."""
    try:
        info = pltpu.get_tpu_info()
        cap = int(getattr(info, "vmem_capacity_bytes", 0) or 0)
        if cap > 0:
            return cap
    except Exception:
        pass
    return 64 * 1024 * 1024


def _make_kernel(embed, acc_width, rows_tile, rows_total, need_mask):
    """Kernel factory.

    embed:      true feature size E (width of the per-stream summed vector)
    acc_width:  width of the VMEM accumulator (128 when lane-packed, E otherwise)
    rows_tile:  rows per grid step along the reduction axis
    rows_total: true number of valid rows (C = S*E/128 when packed, S otherwise)
    need_mask:  whether the last row tile is ragged and must be masked
    """
    groups = acc_width // embed

    def kernel(va_ref, vb_ref, w1a_ref, w1b_ref, b1_ref,
               w2_ref, b2_ref, w3_ref, b3_ref, out_ref, va_acc, vb_acc):
        s = pl.program_id(1)

        @pl.when(s == 0)
        def _init():
            va_acc[...] = jnp.zeros_like(va_acc)
            vb_acc[...] = jnp.zeros_like(vb_acc)

        va = va_ref[...]
        vb = vb_ref[...]
        if need_mask:
            # Zero rows beyond the true extent (ragged last tile). Garbage rows in a
            # ragged *batch* tile are harmless: they only affect their own output rows,
            # which are never written back past the output array bound.
            row = jax.lax.broadcasted_iota(jnp.int32, (1, rows_tile, va.shape[-1]), 1)
            valid = (s * rows_tile + row) < rows_total
            va = jnp.where(valid, va, 0.0)
            vb = jnp.where(valid, vb, 0.0)

        # Partial sum over this row tile: (TB, rows_tile, W) -> (TB, W).
        va_acc[...] += jnp.sum(va, axis=1)
        vb_acc[...] += jnp.sum(vb, axis=1)

        @pl.when(s == pl.num_programs(1) - 1)
        def _finalize():
            a = va_acc[...]
            b = vb_acc[...]
            # Fold the lane-packed (TB, 128) accumulator back to (TB, E): feature index
            # is (lane mod E) because 128 % E == 0.  No-op when groups == 1.
            a_sum = a[:, 0:embed]
            b_sum = b[:, 0:embed]
            for g in range(1, groups):
                a_sum = a_sum + a[:, g * embed:(g + 1) * embed]
                b_sum = b_sum + b[:, g * embed:(g + 1) * embed]

            # First MLP layer: concat([va, vb]) @ W1 + b1, done as a split matmul.
            h1 = jnp.dot(a_sum, w1a_ref[...], preferred_element_type=jnp.float32)
            h1 = h1 + jnp.dot(b_sum, w1b_ref[...], preferred_element_type=jnp.float32)
            h1 = jnp.maximum(h1 + b1_ref[...], 0.0)
            # Second MLP layer.
            h2 = jnp.dot(h1, w2_ref[...], preferred_element_type=jnp.float32) + b2_ref[...]
            h2 = jnp.maximum(h2, 0.0)
            # Final output linear (lane-padded to 128 columns; sliced in the wrapper).
            y = jnp.dot(h2, w3_ref[...], preferred_element_type=jnp.float32) + b3_ref[...]
            out_ref[...] = y.astype(out_ref.dtype)

    return kernel


def aggregate_forward(V_A, V_B, params, *, batch_tile=None, rows_per_step=None):
    """V_A, V_B: (B, S, E) float32. params: W1 (2E,H), b1 (H,), W2 (H,H), b2 (H,),
    W3 (H,O), b3 (O,) stored as (in_features, out_features)."""
    B, S, E = V_A.shape
    assert V_B.shape == (B, S, E)
    W1, b1 = params["W1"], params["b1"]
    W2, b2 = params["W2"], params["b2"]
    W3, b3 = params["W3"], params["b3"]
    assert W1.shape[0] == 2 * E, "num_inputs must equal 2 * embed (concat of summed streams)"
    H = W1.shape[1]
    O = W3.shape[1]

    # ---- lane-dense padding of the tiny weights (zero cols/rows are neutral through
    #      the ReLU MLP; padded output columns are sliced off after the call).
    H_pad = _round_up(H, 128)
    O_pad = _round_up(O, 128)
    W1a = jnp.pad(W1[:E, :], ((0, 0), (0, H_pad - H)))
    W1b = jnp.pad(W1[E:, :], ((0, 0), (0, H_pad - H)))
    b1p = jnp.pad(b1, (0, H_pad - H)).reshape(1, H_pad)
    W2p = jnp.pad(W2, ((0, H_pad - H), (0, H_pad - H)))
    b2p = jnp.pad(b2, (0, H_pad - H)).reshape(1, H_pad)
    W3p = jnp.pad(W3, ((0, H_pad - H), (0, O_pad - O)))
    b3p = jnp.pad(b3, (0, O_pad - O)).reshape(1, O_pad)

    # ---- lane packing of the dominant (B, S, E) streams (free, contiguous reshape).
    L = S * E
    packed = (E <= 128) and (128 % E == 0) and (L % 128 == 0)
    if packed:
        width = 128
        rows_total = L // 128
        va_in = V_A.reshape(B, rows_total, width)
        vb_in = V_B.reshape(B, rows_total, width)
        acc_width = 128
    else:
        # TODO(synk): when E does not pack into 128 lanes, fall back to the unpacked
        # (B, S, E) layout (last dim under-fills the 128 lanes but stays correct).
        width = E
        rows_total = S
        va_in = V_A
        vb_in = V_B
        acc_width = E

    # ---- batch tile: keep >= 2 batch tiles when B > 8 so the "parallel" batch axis
    #      feeds both v7x TensorCores (harmless on single-core v5e/v6e).
    if batch_tile is not None:
        TB = max(1, int(batch_tile))
    else:
        TB = min(B, 256)
        if B > 8:
            TB = min(TB, max(8, _round_up(_cdiv(B, 2), 8)))
    if TB >= B:
        TB = B                        # single tile, block dim equals full array dim
    else:
        TB = max(8, (TB // 8) * 8)    # partial tiles need the 8-sublane divisibility
    num_batch_tiles = _cdiv(B, TB)

    # ---- generation-aware VMEM budget (v5e/v6e: 128 MiB, v7x: 64 MiB per core).
    vmem_cap = _vmem_capacity_bytes()
    vmem_target = max(32 << 20, (vmem_cap * 3) // 4)

    width_eff = _round_up(width, 128)
    weight_bytes = 4 * (2 * _round_up(E, 8) * H_pad
                        + _round_up(H_pad, 8) * H_pad
                        + _round_up(H_pad, 8) * O_pad
                        + 2 * 8 * H_pad + 8 * O_pad)          # single-buffered weights
    out_bytes = 2 * _round_up(TB, 8) * O_pad * 4              # double-buffered output
    acc_bytes = 2 * _round_up(TB, 8) * 128 * 4                # accumulators
    data_budget = vmem_target - weight_bytes - out_bytes - acc_bytes - (2 << 20)

    per_row_bytes = 2 * 2 * TB * width_eff * 4                # 2 streams x double buffer
    if rows_per_step is not None:
        cand = max(1, int(rows_per_step))
    else:
        cand = max(8, data_budget // per_row_bytes) if data_budget > 0 else 8
    if cand >= rows_total:
        rows_tile = rows_total
    else:
        rows_tile = max(8, (cand // 8) * 8)
        rows_tile = min(rows_tile, _round_up(rows_total, 8))
        if rows_tile >= rows_total:
            rows_tile = rows_total
    need_mask = (rows_total % rows_tile) != 0
    num_row_tiles = _cdiv(rows_total, rows_tile)

    data_bytes = 2 * 2 * TB * _round_up(rows_tile, 8) * width_eff * 4
    est_total = data_bytes + weight_bytes + out_bytes + acc_bytes

    grid = (num_batch_tiles, num_row_tiles)
    kernel = _make_kernel(E, acc_width, rows_tile, rows_total, need_mask)
    const_map = lambda i, s: (0, 0)               # weights: fetched once, VMEM-resident
    data_map = lambda i, s: (i, s, 0)

    def _run(single_buffer_weights):
        wkw = dict(pipeline_mode=pl.Buffered(1)) if single_buffer_weights else {}
        in_specs = [
            pl.BlockSpec((TB, rows_tile, width), data_map),        # V_A (stream)
            pl.BlockSpec((TB, rows_tile, width), data_map),        # V_B (stream)
            pl.BlockSpec((E, H_pad), const_map, **wkw),            # W1[:E]
            pl.BlockSpec((E, H_pad), const_map, **wkw),            # W1[E:]
            pl.BlockSpec((1, H_pad), const_map, **wkw),            # b1
            pl.BlockSpec((H_pad, H_pad), const_map, **wkw),        # W2
            pl.BlockSpec((1, H_pad), const_map, **wkw),            # b2
            pl.BlockSpec((H_pad, O_pad), const_map, **wkw),        # W3
            pl.BlockSpec((1, O_pad), const_map, **wkw),            # b3
        ]
        grid_spec = pltpu.PrefetchScalarGridSpec(
            num_scalar_prefetch=0,
            grid=grid,
            in_specs=in_specs,
            out_specs=pl.BlockSpec((TB, O_pad), lambda i, s: (i, 0)),
            scratch_shapes=[pltpu.VMEM((TB, acc_width), jnp.float32),
                            pltpu.VMEM((TB, acc_width), jnp.float32)],
        )
        est = est_total if single_buffer_weights else est_total + weight_bytes
        vmem_limit = int(min(max(est + (6 << 20), 32 << 20), (vmem_cap * 4) // 5))
        vmem_limit = max(vmem_limit, est + (2 << 20))
        return pl.pallas_call(
            kernel,
            out_shape=jax.ShapeDtypeStruct((B, O_pad), jnp.float32),
            grid_spec=grid_spec,
            compiler_params=pltpu.CompilerParams(
                dimension_semantics=("parallel", "arbitrary"),
                vmem_limit_bytes=vmem_limit,
            ),
        )(va_in, vb_in, W1a, W1b, b1p, W2p, b2p, W3p, b3p)

    try:
        out = _run(True)
    except Exception:
        # pl.Buffered(1) (single-buffered weights) unsupported on this JAX version:
        # fall back to default double-buffered weight blocks.
        out = _run(False)

    return out[:, :O]


def init_params(key, num_inputs, num_hiddens, num_outputs):
    """Deterministic synthetic parameter init (mimics nn.Linear fan_in scaling)."""
    ks = jax.random.split(key, 6)

    def lin(kw, kb, fan_in, fan_out):
        bound = 1.0 / jnp.sqrt(fan_in)
        W = jax.random.uniform(kw, (fan_in, fan_out), jnp.float32, -bound, bound)
        b = jax.random.uniform(kb, (fan_out,), jnp.float32, -bound, bound)
        return W, b

    W1, b1 = lin(ks[0], ks[1], num_inputs, num_hiddens)
    W2, b2 = lin(ks[2], ks[3], num_hiddens, num_hiddens)
    W3, b3 = lin(ks[4], ks[5], num_hiddens, num_outputs)
    return {"W1": W1, "b1": b1, "W2": W2, "b2": b2, "W3": W3, "b3": b3}


def reference_forward(V_A, V_B, params):
    va = V_A.sum(axis=1)
    vb = V_B.sum(axis=1)
    x = jnp.concatenate([va, vb], axis=1)
    h = jnp.maximum(x @ params["W1"] + params["b1"], 0.0)
    h = jnp.maximum(h @ params["W2"] + params["b2"], 0.0)
    return h @ params["W3"] + params["b3"]


if __name__ == "__main__":
    # TODO(synk): dropout inside `mlp` is identity at inference and is not modeled.
    batch, seq, embed = 2, 8, 32
    num_inputs = 2 * embed           # concat of the two summed streams
    num_hiddens = 32
    num_outputs = 4

    key = jax.random.PRNGKey(0)
    k_a, k_b, k_p = jax.random.split(key, 3)
    V_A = jax.random.normal(k_a, (batch, seq, embed), jnp.float32)
    V_B = jax.random.normal(k_b, (batch, seq, embed), jnp.float32)
    params = init_params(k_p, num_inputs, num_hiddens, num_outputs)

    out = jax.block_until_ready(aggregate_forward(V_A, V_B, params))
    ref = reference_forward(V_A, V_B, params)
    assert out.shape == (batch, num_outputs)
    assert jnp.allclose(out, ref, atol=5e-4, rtol=5e-4), "mismatch vs reference (demo)"

    # Lane-packed path with a multi-step reduction, a ragged last row tile and a
    # ragged final batch tile (exercises in-kernel masking; no wrapper-side pads).
    batch2, seq2 = 10, 100
    kA2, kB2 = jax.random.split(jax.random.PRNGKey(1), 2)
    VA2 = jax.random.normal(kA2, (batch2, seq2, embed), jnp.float32)
    VB2 = jax.random.normal(kB2, (batch2, seq2, embed), jnp.float32)
    out2 = jax.block_until_ready(aggregate_forward(VA2, VB2, params, rows_per_step=8))
    ref2 = reference_forward(VA2, VB2, params)
    assert out2.shape == (batch2, num_outputs)
    assert jnp.allclose(out2, ref2, atol=5e-4, rtol=5e-4), "mismatch vs reference (packed)"

    # Fallback (un-packed) path: S*E not a multiple of 128 lanes, ragged seq tile.
    batch3, seq3 = 3, 10
    kA3, kB3 = jax.random.split(jax.random.PRNGKey(2), 2)
    VA3 = jax.random.normal(kA3, (batch3, seq3, embed), jnp.float32)
    VB3 = jax.random.normal(kB3, (batch3, seq3, embed), jnp.float32)
    out3 = jax.block_until_ready(aggregate_forward(VA3, VB3, params, rows_per_step=8))
    ref3 = reference_forward(VA3, VB3, params)
    assert out3.shape == (batch3, num_outputs)
    assert jnp.allclose(out3, ref3, atol=5e-4, rtol=5e-4), "mismatch vs reference (fallback)"

    print("KERNEL_OK")
</pallas_src>

<mosaic_0001>
module attributes {stable_mosaic.version = 11 : i64} {
  func.func @kernel(%arg0: i32, %arg1: i32, %arg2: memref<2x2x128xf32, #tpu.memory_space<vmem>>, %arg3: memref<2x2x128xf32, #tpu.memory_space<vmem>>, %arg4: memref<32x128xf32, #tpu.memory_space<vmem>>, %arg5: memref<32x128xf32, #tpu.memory_space<vmem>>, %arg6: memref<1x128xf32, #tpu.memory_space<vmem>>, %arg7: memref<128x128xf32, #tpu.memory_space<vmem>>, %arg8: memref<1x128xf32, #tpu.memory_space<vmem>>, %arg9: memref<128x128xf32, #tpu.memory_space<vmem>>, %arg10: memref<1x128xf32, #tpu.memory_space<vmem>>, %arg11: memref<2x128xf32, #tpu.memory_space<vmem>>, %arg12: memref<2x128xf32, #tpu.memory_space<vmem>>, %arg13: memref<2x128xf32, #tpu.memory_space<vmem>>) attributes {dimension_semantics = [#tpu.dimension_semantics<parallel>, #tpu.dimension_semantics<arbitrary>], iteration_bounds = array<i64: 1, 1>, scalar_prefetch = 0 : i64, scratch_operands = 2 : i64, tpu.core_type = #tpu.core_type<tc>, window_params = [{transform_indices = @transform_0, window_bounds = array<i64: 2, 2, 128>}, {transform_indices = @transform_1, window_bounds = array<i64: 2, 2, 128>}, {pipeline_mode = #tpu.pipeline_mode<synchronous>, transform_indices = @transform_2, window_bounds = array<i64: 32, 128>}, {pipeline_mode = #tpu.pipeline_mode<synchronous>, transform_indices = @transform_3, window_bounds = array<i64: 32, 128>}, {pipeline_mode = #tpu.pipeline_mode<synchronous>, transform_indices = @transform_4, window_bounds = array<i64: 1, 128>}, {pipeline_mode = #tpu.pipeline_mode<synchronous>, transform_indices = @transform_5, window_bounds = array<i64: 128, 128>}, {pipeline_mode = #tpu.pipeline_mode<synchronous>, transform_indices = @transform_6, window_bounds = array<i64: 1, 128>}, {pipeline_mode = #tpu.pipeline_mode<synchronous>, transform_indices = @transform_7, window_bounds = array<i64: 128, 128>}, {pipeline_mode = #tpu.pipeline_mode<synchronous>, transform_indices = @transform_8, window_bounds = array<i64: 1, 128>}, {transform_indices = @transform_9, window_bounds = array<i64: 2, 128>}]} {
    %c0_i32 = arith.constant 0 : i32
    %0 = arith.cmpi eq, %arg1, %c0_i32 : i32
    %1 = arith.extui %0 : i1 to i32
    %c0_i32_0 = arith.constant 0 : i32
    %2 = arith.cmpi ne, %1, %c0_i32_0 : i32
    scf.if %2 {
      %cst_17 = arith.constant 0.000000e+00 : f32
      %16 = vector.broadcast %cst_17 : f32 to vector<2x128xf32>
      %c0_18 = arith.constant 0 : index
      %c0_19 = arith.constant 0 : index
      %17 = vector.load %arg12[%c0_18, %c0_19] : memref<2x128xf32, #tpu.memory_space<vmem>>, vector<2x128xf32>
      tpu.vector_store %arg12[%c0_18, %c0_19], %16 {strides = array<i32>} : memref<2x128xf32, #tpu.memory_space<vmem>>, vector<2x128xf32>,
      %cst_20 = arith.constant 0.000000e+00 : f32
      %18 = vector.broadcast %cst_20 : f32 to vector<2x128xf32>
      %c0_21 = arith.constant 0 : index
      %c0_22 = arith.constant 0 : index
      %19 = vector.load %arg13[%c0_21, %c0_22] : memref<2x128xf32, #tpu.memory_space<vmem>>, vector<2x128xf32>
      tpu.vector_store %arg13[%c0_21, %c0_22], %18 {strides = array<i32>} : memref<2x128xf32, #tpu.memory_space<vmem>>, vector<2x128xf32>,
    } else {
    }
    %c0 = arith.constant 0 : index
    %c0_1 = arith.constant 0 : index
    %c0_2 = arith.constant 0 : index
    %3 = vector.load %arg2[%c0, %c0_1, %c0_2] : memref<2x2x128xf32, #tpu.memory_space<vmem>>, vector<2x2x128xf32>
    %c0_3 = arith.constant 0 : index
    %c0_4 = arith.constant 0 : index
    %c0_5 = arith.constant 0 : index
    %4 = vector.load %arg3[%c0_3, %c0_4, %c0_5] : memref<2x2x128xf32, #tpu.memory_space<vmem>>, vector<2x2x128xf32>
    %c0_6 = arith.constant 0 : index
    %c0_7 = arith.constant 0 : index
    %5 = vector.load %arg12[%c0_6, %c0_7] : memref<2x128xf32, #tpu.memory_space<vmem>>, vector<2x128xf32>
    %cst = arith.constant dense<0.000000e+00> : vector<2x128xf32>
    %6 = vector.multi_reduction <add>, %3, %cst [1] : vector<2x2x128xf32> to vector<2x128xf32>
    %7 = arith.addf %5, %6 : vector<2x128xf32>
    %c0_8 = arith.constant 0 : index
    %c0_9 = arith.constant 0 : index
    %8 = vector.load %arg12[%c0_8, %c0_9] : memref<2x128xf32, #tpu.memory_space<vmem>>, vector<2x128xf32>
    tpu.vector_store %arg12[%c0_8, %c0_9], %7 {strides = array<i32>} : memref<2x128xf32, #tpu.memory_space<vmem>>, vector<2x128xf32>,
    %c0_10 = arith.constant 0 : index
    %c0_11 = arith.constant 0 : index
    %9 = vector.load %arg13[%c0_10, %c0_11] : memref<2x128xf32, #tpu.memory_space<vmem>>, vector<2x128xf32>
    %cst_12 = arith.constant dense<0.000000e+00> : vector<2x128xf32>
    %10 = vector.multi_reduction <add>, %4, %cst_12 [1] : vector<2x2x128xf32> to vector<2x128xf32>
    %11 = arith.addf %9, %10 : vector<2x128xf32>
    %c0_13 = arith.constant 0 : index
    %c0_14 = arith.constant 0 : index
    %12 = vector.load %arg13[%c0_13, %c0_14] : memref<2x128xf32, #tpu.memory_space<vmem>>, vector<2x128xf32>
    tpu.vector_store %arg13[%c0_13, %c0_14], %11 {strides = array<i32>} : memref<2x128xf32, #tpu.memory_space<vmem>>, vector<2x128xf32>,
    %c0_i32_15 = arith.constant 0 : i32
    %13 = arith.cmpi eq, %arg1, %c0_i32_15 : i32
    %14 = arith.extui %13 : i1 to i32
    %c0_i32_16 = arith.constant 0 : i32
    %15 = arith.cmpi ne, %14, %c0_i32_16 : i32
    scf.if %15 {
      %c0_17 = arith.constant 0 : index
      %c0_18 = arith.constant 0 : index
      %16 = vector.load %arg12[%c0_17, %c0_18] : memref<2x128xf32, #tpu.memory_space<vmem>>, vector<2x128xf32>
      %c0_19 = arith.constant 0 : index
      %c0_20 = arith.constant 0 : index
      %17 = vector.load %arg13[%c0_19, %c0_20] : memref<2x128xf32, #tpu.memory_space<vmem>>, vector<2x128xf32>
      %18 = vector.extract_strided_slice %16 {offsets = [0, 0], sizes = [2, 32], strides = [1, 1]} : vector<2x128xf32> to vector<2x32xf32>
      %19 = vector.extract_strided_slice %17 {offsets = [0, 0], sizes = [2, 32], strides = [1, 1]} : vector<2x128xf32> to vector<2x32xf32>
      %20 = vector.extract_strided_slice %16 {offsets = [0, 32], sizes = [2, 32], strides = [1, 1]} : vector<2x128xf32> to vector<2x32xf32>
      %21 = arith.addf %18, %20 : vector<2x32xf32>
      %22 = vector.extract_strided_slice %17 {offsets = [0, 32], sizes = [2, 32], strides = [1, 1]} : vector<2x128xf32> to vector<2x32xf32>
      %23 = arith.addf %19, %22 : vector<2x32xf32>
      %24 = vector.extract_strided_slice %16 {offsets = [0, 64], sizes = [2, 32], strides = [1, 1]} : vector<2x128xf32> to vector<2x32xf32>
      %25 = arith.addf %21, %24 : vector<2x32xf32>
      %26 = vector.extract_strided_slice %17 {offsets = [0, 64], sizes = [2, 32], strides = [1, 1]} : vector<2x128xf32> to vector<2x32xf32>
      %27 = arith.addf %23, %26 : vector<2x32xf32>
      %28 = vector.extract_strided_slice %16 {offsets = [0, 96], sizes = [2, 32], strides = [1, 1]} : vector<2x128xf32> to vector<2x32xf32>
      %29 = arith.addf %25, %28 : vector<2x32xf32>
      %30 = vector.extract_strided_slice %17 {offsets = [0, 96], sizes = [2, 32], strides = [1, 1]} : vector<2x128xf32> to vector<2x32xf32>
      %31 = arith.addf %27, %30 : vector<2x32xf32>
      %c0_21 = arith.constant 0 : index
      %c0_22 = arith.constant 0 : index
      %32 = vector.load %arg4[%c0_21, %c0_22] : memref<32x128xf32, #tpu.memory_space<vmem>>, vector<32x128xf32>
      %cst_23 = arith.constant dense<0.000000e+00> : vector<2x128xf32>
      %33 = tpu.matmul %29, %32, %cst_23 {dimension_numbers = #tpu.dot_dimension_numbers<[1], [0], [0], [1], [0, 0, 1, 1], [], []>} : vector<2x32xf32>, vector<32x128xf32>, vector<2x128xf32> -> vector<2x128xf32>
      %c0_24 = arith.constant 0 : index
      %c0_25 = arith.constant 0 : index
      %34 = vector.load %arg5[%c0_24, %c0_25] : memref<32x128xf32, #tpu.memory_space<vmem>>, vector<32x128xf32>
      %cst_26 = arith.constant dense<0.000000e+00> : vector<2x128xf32>
      %35 = tpu.matmul %31, %34, %cst_26 {dimension_numbers = #tpu.dot_dimension_numbers<[1], [0], [0], [1], [0, 0, 1, 1], [], []>} : vector<2x32xf32>, vector<32x128xf32>, vector<2x128xf32> -> vector<2x128xf32>
      %36 = arith.addf %33, %35 : vector<2x128xf32>
      %c0_27 = arith.constant 0 : index
      %c0_28 = arith.constant 0 : index
      %37 = vector.load %arg6[%c0_27, %c0_28] : memref<1x128xf32, #tpu.memory_space<vmem>>, vector<1x128xf32>
      %38 = vector.broadcast %37 : vector<1x128xf32> to vector<2x128xf32>
      %39 = arith.addf %36, %38 : vector<2x128xf32>
      %cst_29 = arith.constant 0.000000e+00 : f32
      %40 = vector.broadcast %cst_29 : f32 to vector<2x128xf32>
      %41 = arith.maximumf %39, %40 : vector<2x128xf32>
      %c0_30 = arith.constant 0 : index
      %c0_31 = arith.constant 0 : index
      %42 = vector.load %arg7[%c0_30, %c0_31] : memref<128x128xf32, #tpu.memory_space<vmem>>, vector<128x128xf32>
      %cst_32 = arith.constant dense<0.000000e+00> : vector<2x128xf32>
      %43 = tpu.matmul %41, %42, %cst_32 {dimension_numbers = #tpu.dot_dimension_numbers<[1], [0], [0], [1], [0, 0, 1, 1], [], []>} : vector<2x128xf32>, vector<128x128xf32>, vector<2x128xf32> -> vector<2x128xf32>
      %c0_33 = arith.constant 0 : index
      %c0_34 = arith.constant 0 : index
      %44 = vector.load %arg8[%c0_33, %c0_34] : memref<1x128xf32, #tpu.memory_space<vmem>>, vector<1x128xf32>
      %45 = vector.broadcast %44 : vector<1x128xf32> to vector<2x128xf32>
      %46 = arith.addf %43, %45 : vector<2x128xf32>
      %cst_35 = arith.constant 0.000000e+00 : f32
      %47 = vector.broadcast %cst_35 : f32 to vector<2x128xf32>
      %48 = arith.maximumf %46, %47 : vector<2x128xf32>
      %c0_36 = arith.constant 0 : index
      %c0_37 = arith.constant 0 : index
      %49 = vector.load %arg9[%c0_36, %c0_37] : memref<128x128xf32, #tpu.memory_space<vmem>>, vector<128x128xf32>
      %cst_38 = arith.constant dense<0.000000e+00> : vector<2x128xf32>
      %50 = tpu.matmul %48, %49, %cst_38 {dimension_numbers = #tpu.dot_dimension_numbers<[1], [0], [0], [1], [0, 0, 1, 1], [], []>} : vector<2x128xf32>, vector<128x128xf32>, vector<2x128xf32> -> vector<2x128xf32>
      %c0_39 = arith.constant 0 : index
      %c0_40 = arith.constant 0 : index
      %51 = vector.load %arg10[%c0_39, %c0_40] : memref<1x128xf32, #tpu.memory_space<vmem>>, vector<1x128xf32>
      %52 = vector.broadcast %51 : vector<1x128xf32> to vector<2x128xf32>
      %53 = arith.addf %50, %52 : vector<2x128xf32>
      %c0_41 = arith.constant 0 : index
      %c0_42 = arith.constant 0 : index
      %54 = vector.load %arg11[%c0_41, %c0_42] : memref<2x128xf32, #tpu.memory_space<vmem>>, vector<2x128xf32>
      tpu.vector_store %arg11[%c0_41, %c0_42], %53 {strides = array<i32>} : memref<2x128xf32, #tpu.memory_space<vmem>>, vector<2x128xf32>,
    } else {
    }
    return
  }
  func.func @transform_0(%arg0: i32, %arg1: i32) -> (i32, i32, i32) {
    %c0_i32 = arith.constant 0 : i32
    %c0_i32_0 = arith.constant 0 : i32
    return %arg0, %arg1, %c0_i32 : i32, i32, i32
  }
  func.func @transform_1(%arg0: i32, %arg1: i32) -> (i32, i32, i32) {
    %c0_i32 = arith.constant 0 : i32
    %c0_i32_0 = arith.constant 0 : i32
    return %arg0, %arg1, %c0_i32 : i32, i32, i32
  }
  func.func @transform_2(%arg0: i32, %arg1: i32) -> (i32, i32) {
    %c0_i32 = arith.constant 0 : i32
    %c0_i32_0 = arith.constant 0 : i32
    %c0_i32_1 = arith.constant 0 : i32
    return %c0_i32, %c0_i32_0 : i32, i32
  }
  func.func @transform_3(%arg0: i32, %arg1: i32) -> (i32, i32) {
    %c0_i32 = arith.constant 0 : i32
    %c0_i32_0 = arith.constant 0 : i32
    %c0_i32_1 = arith.constant 0 : i32
    return %c0_i32, %c0_i32_0 : i32, i32
  }
  func.func @transform_4(%arg0: i32, %arg1: i32) -> (i32, i32) {
    %c0_i32 = arith.constant 0 : i32
    %c0_i32_0 = arith.constant 0 : i32
    %c0_i32_1 = arith.constant 0 : i32
    return %c0_i32, %c0_i32_0 : i32, i32
  }
  func.func @transform_5(%arg0: i32, %arg1: i32) -> (i32, i32) {
    %c0_i32 = arith.constant 0 : i32
    %c0_i32_0 = arith.constant 0 : i32
    %c0_i32_1 = arith.constant 0 : i32
    return %c0_i32, %c0_i32_0 : i32, i32
  }
  func.func @transform_6(%arg0: i32, %arg1: i32) -> (i32, i32) {
    %c0_i32 = arith.constant 0 : i32
    %c0_i32_0 = arith.constant 0 : i32
    %c0_i32_1 = arith.constant 0 : i32
    return %c0_i32, %c0_i32_0 : i32, i32
  }
  func.func @transform_7(%arg0: i32, %arg1: i32) -> (i32, i32) {
    %c0_i32 = arith.constant 0 : i32
    %c0_i32_0 = arith.constant 0 : i32
    %c0_i32_1 = arith.constant 0 : i32
    return %c0_i32, %c0_i32_0 : i32, i32
  }
  func.func @transform_8(%arg0: i32, %arg1: i32) -> (i32, i32) {
    %c0_i32 = arith.constant 0 : i32
    %c0_i32_0 = arith.constant 0 : i32
    %c0_i32_1 = arith.constant 0 : i32
    return %c0_i32, %c0_i32_0 : i32, i32
  }
  func.func @transform_9(%arg0: i32, %arg1: i32) -> (i32, i32) {
    %c0_i32 = arith.constant 0 : i32
    %c0_i32_0 = arith.constant 0 : i32
    return %arg0, %c0_i32 : i32, i32
  }
}

module attributes {stable_mosaic.version = 11 : i64} {
  func.func @kernel(%arg0: i32, %arg1: i32, %arg2: memref<2x2x128xf32, #tpu.memory_space<vmem>>, %arg3: memref<2x2x128xf32, #tpu.memory_space<vmem>>, %arg4: memref<32x128xf32, #tpu.memory_space<vmem>>, %arg5: memref<32x128xf32, #tpu.memory_space<vmem>>, %arg6: memref<1x128xf32, #tpu.memory_space<vmem>>, %arg7: memref<128x128xf32, #tpu.memory_space<vmem>>, %arg8: memref<1x128xf32, #tpu.memory_space<vmem>>, %arg9: memref<128x128xf32, #tpu.memory_space<vmem>>, %arg10: memref<1x128xf32, #tpu.memory_space<vmem>>, %arg11: memref<2x128xf32, #tpu.memory_space<vmem>>, %arg12: memref<2x128xf32, #tpu.memory_space<vmem>>, %arg13: memref<2x128xf32, #tpu.memory_space<vmem>>) attributes {dimension_semantics = [#tpu.dimension_semantics<parallel>, #tpu.dimension_semantics<arbitrary>], iteration_bounds = array<i64: 1, 1>, scalar_prefetch = 0 : i64, scratch_operands = 2 : i64, tpu.core_type = #tpu.core_type<tc>, window_params = [{transform_indices = @transform_0, window_bounds = array<i64: 2, 2, 128>}, {transform_indices = @transform_1, window_bounds = array<i64: 2, 2, 128>}, {pipeline_mode = #tpu.pipeline_mode<synchronous>, transform_indices = @transform_2, window_bounds = array<i64: 32, 128>}, {pipeline_mode = #tpu.pipeline_mode<synchronous>, transform_indices = @transform_3, window_bounds = array<i64: 32, 128>}, {pipeline_mode = #tpu.pipeline_mode<synchronous>, transform_indices = @transform_4, window_bounds = array<i64: 1, 128>}, {pipeline_mode = #tpu.pipeline_mode<synchronous>, transform_indices = @transform_5, window_bounds = array<i64: 128, 128>}, {pipeline_mode = #tpu.pipeline_mode<synchronous>, transform_indices = @transform_6, window_bounds = array<i64: 1, 128>}, {pipeline_mode = #tpu.pipeline_mode<synchronous>, transform_indices = @transform_7, window_bounds = array<i64: 128, 128>}, {pipeline_mode = #tpu.pipeline_mode<synchronous>, transform_indices = @transform_8, window_bounds = array<i64: 1, 128>}, {transform_indices = @transform_9, window_bounds = array<i64: 2, 128>}]} {
    %c0_i32 = arith.constant 0 : i32
    %0 = arith.cmpi eq, %arg1, %c0_i32 : i32
    %1 = arith.extui %0 : i1 to i32
    %c0_i32_0 = arith.constant 0 : i32
    %2 = arith.cmpi ne, %1, %c0_i32_0 : i32
    scf.if %2 {
      %cst_17 = arith.constant 0.000000e+00 : f32
      %16 = vector.broadcast %cst_17 : f32 to vector<2x128xf32>
      %c0_18 = arith.constant 0 : index
      %c0_19 = arith.constant 0 : index
      %17 = vector.load %arg12[%c0_18, %c0_19] : memref<2x128xf32, #tpu.memory_space<vmem>>, vector<2x128xf32>
      tpu.vector_store %arg12[%c0_18, %c0_19], %16 {strides = array<i32>} : memref<2x128xf32, #tpu.memory_space<vmem>>, vector<2x128xf32>,
      %cst_20 = arith.constant 0.000000e+00 : f32
      %18 = vector.broadcast %cst_20 : f32 to vector<2x128xf32>
      %c0_21 = arith.constant 0 : index
      %c0_22 = arith.constant 0 : index
      %19 = vector.load %arg13[%c0_21, %c0_22] : memref<2x128xf32, #tpu.memory_space<vmem>>, vector<2x128xf32>
      tpu.vector_store %arg13[%c0_21, %c0_22], %18 {strides = array<i32>} : memref<2x128xf32, #tpu.memory_space<vmem>>, vector<2x128xf32>,
    } else {
    }
    %c0 = arith.constant 0 : index
    %c0_1 = arith.constant 0 : index
    %c0_2 = arith.constant 0 : index
    %3 = vector.load %arg2[%c0, %c0_1, %c0_2] : memref<2x2x128xf32, #tpu.memory_space<vmem>>, vector<2x2x128xf32>
    %c0_3 = arith.constant 0 : index
    %c0_4 = arith.constant 0 : index
    %c0_5 = arith.constant 0 : index
    %4 = vector.load %arg3[%c0_3, %c0_4, %c0_5] : memref<2x2x128xf32, #tpu.memory_space<vmem>>, vector<2x2x128xf32>
    %c0_6 = arith.constant 0 : index
    %c0_7 = arith.constant 0 : index
    %5 = vector.load %arg12[%c0_6, %c0_7] : memref<2x128xf32, #tpu.memory_space<vmem>>, vector<2x128xf32>
    %cst = arith.constant dense<0.000000e+00> : vector<2x128xf32>
    %6 = vector.multi_reduction <add>, %3, %cst [1] : vector<2x2x128xf32> to vector<2x128xf32>
    %7 = arith.addf %5, %6 : vector<2x128xf32>
    %c0_8 = arith.constant 0 : index
    %c0_9 = arith.constant 0 : index
    %8 = vector.load %arg12[%c0_8, %c0_9] : memref<2x128xf32, #tpu.memory_space<vmem>>, vector<2x128xf32>
    tpu.vector_store %arg12[%c0_8, %c0_9], %7 {strides = array<i32>} : memref<2x128xf32, #tpu.memory_space<vmem>>, vector<2x128xf32>,
    %c0_10 = arith.constant 0 : index
    %c0_11 = arith.constant 0 : index
    %9 = vector.load %arg13[%c0_10, %c0_11] : memref<2x128xf32, #tpu.memory_space<vmem>>, vector<2x128xf32>
    %cst_12 = arith.constant dense<0.000000e+00> : vector<2x128xf32>
    %10 = vector.multi_reduction <add>, %4, %cst_12 [1] : vector<2x2x128xf32> to vector<2x128xf32>
    %11 = arith.addf %9, %10 : vector<2x128xf32>
    %c0_13 = arith.constant 0 : index
    %c0_14 = arith.constant 0 : index
    %12 = vector.load %arg13[%c0_13, %c0_14] : memref<2x128xf32, #tpu.memory_space<vmem>>, vector<2x128xf32>
    tpu.vector_store %arg13[%c0_13, %c0_14], %11 {strides = array<i32>} : memref<2x128xf32, #tpu.memory_space<vmem>>, vector<2x128xf32>,
    %c0_i32_15 = arith.constant 0 : i32
    %13 = arith.cmpi eq, %arg1, %c0_i32_15 : i32
    %14 = arith.extui %13 : i1 to i32
    %c0_i32_16 = arith.constant 0 : i32
    %15 = arith.cmpi ne, %14, %c0_i32_16 : i32
    scf.if %15 {
      %c0_17 = arith.constant 0 : index
      %c0_18 = arith.constant 0 : index
      %16 = vector.load %arg12[%c0_17, %c0_18] : memref<2x128xf32, #tpu.memory_space<vmem>>, vector<2x128xf32>
      %c0_19 = arith.constant 0 : index
      %c0_20 = arith.constant 0 : index
      %17 = vector.load %arg13[%c0_19, %c0_20] : memref<2x128xf32, #tpu.memory_space<vmem>>, vector<2x128xf32>
      %18 = vector.extract_strided_slice %16 {offsets = [0, 0], sizes = [2, 32], strides = [1, 1]} : vector<2x128xf32> to vector<2x32xf32>
      %19 = vector.extract_strided_slice %17 {offsets = [0, 0], sizes = [2, 32], strides = [1, 1]} : vector<2x128xf32> to vector<2x32xf32>
      %20 = vector.extract_strided_slice %16 {offsets = [0, 32], sizes = [2, 32], strides = [1, 1]} : vector<2x128xf32> to vector<2x32xf32>
      %21 = arith.addf %18, %20 : vector<2x32xf32>
      %22 = vector.extract_strided_slice %17 {offsets = [0, 32], sizes = [2, 32], strides = [1, 1]} : vector<2x128xf32> to vector<2x32xf32>
      %23 = arith.addf %19, %22 : vector<2x32xf32>
      %24 = vector.extract_strided_slice %16 {offsets = [0, 64], sizes = [2, 32], strides = [1, 1]} : vector<2x128xf32> to vector<2x32xf32>
      %25 = arith.addf %21, %24 : vector<2x32xf32>
      %26 = vector.extract_strided_slice %17 {offsets = [0, 64], sizes = [2, 32], strides = [1, 1]} : vector<2x128xf32> to vector<2x32xf32>
      %27 = arith.addf %23, %26 : vector<2x32xf32>
      %28 = vector.extract_strided_slice %16 {offsets = [0, 96], sizes = [2, 32], strides = [1, 1]} : vector<2x128xf32> to vector<2x32xf32>
      %29 = arith.addf %25, %28 : vector<2x32xf32>
      %30 = vector.extract_strided_slice %17 {offsets = [0, 96], sizes = [2, 32], strides = [1, 1]} : vector<2x128xf32> to vector<2x32xf32>
      %31 = arith.addf %27, %30 : vector<2x32xf32>
      %c0_21 = arith.constant 0 : index
      %c0_22 = arith.constant 0 : index
      %32 = vector.load %arg4[%c0_21, %c0_22] : memref<32x128xf32, #tpu.memory_space<vmem>>, vector<32x128xf32>
      %cst_23 = arith.constant dense<0.000000e+00> : vector<2x128xf32>
      %33 = tpu.matmul %29, %32, %cst_23 {dimension_numbers = #tpu.dot_dimension_numbers<[1], [0], [0], [1], [0, 0, 1, 1], [], []>} : vector<2x32xf32>, vector<32x128xf32>, vector<2x128xf32> -> vector<2x128xf32>
      %c0_24 = arith.constant 0 : index
      %c0_25 = arith.constant 0 : index
      %34 = vector.load %arg5[%c0_24, %c0_25] : memref<32x128xf32, #tpu.memory_space<vmem>>, vector<32x128xf32>
      %cst_26 = arith.constant dense<0.000000e+00> : vector<2x128xf32>
      %35 = tpu.matmul %31, %34, %cst_26 {dimension_numbers = #tpu.dot_dimension_numbers<[1], [0], [0], [1], [0, 0, 1, 1], [], []>} : vector<2x32xf32>, vector<32x128xf32>, vector<2x128xf32> -> vector<2x128xf32>
      %36 = arith.addf %33, %35 : vector<2x128xf32>
      %c0_27 = arith.constant 0 : index
      %c0_28 = arith.constant 0 : index
      %37 = vector.load %arg6[%c0_27, %c0_28] : memref<1x128xf32, #tpu.memory_space<vmem>>, vector<1x128xf32>
      %38 = vector.broadcast %37 : vector<1x128xf32> to vector<2x128xf32>
      %39 = arith.addf %36, %38 : vector<2x128xf32>
      %cst_29 = arith.constant 0.000000e+00 : f32
      %40 = vector.broadcast %cst_29 : f32 to vector<2x128xf32>
      %41 = arith.maximumf %39, %40 : vector<2x128xf32>
      %c0_30 = arith.constant 0 : index
      %c0_31 = arith.constant 0 : index
      %42 = vector.load %arg7[%c0_30, %c0_31] : memref<128x128xf32, #tpu.memory_space<vmem>>, vector<128x128xf32>
      %cst_32 = arith.constant dense<0.000000e+00> : vector<2x128xf32>
      %43 = tpu.matmul %41, %42, %cst_32 {dimension_numbers = #tpu.dot_dimension_numbers<[1], [0], [0], [1], [0, 0, 1, 1], [], []>} : vector<2x128xf32>, vector<128x128xf32>, vector<2x128xf32> -> vector<2x128xf32>
      %c0_33 = arith.constant 0 : index
      %c0_34 = arith.constant 0 : index
      %44 = vector.load %arg8[%c0_33, %c0_34] : memref<1x128xf32, #tpu.memory_space<vmem>>, vector<1x128xf32>
      %45 = vector.broadcast %44 : vector<1x128xf32> to vector<2x128xf32>
      %46 = arith.addf %43, %45 : vector<2x128xf32>
      %cst_35 = arith.constant 0.000000e+00 : f32
      %47 = vector.broadcast %cst_35 : f32 to vector<2x128xf32>
      %48 = arith.maximumf %46, %47 : vector<2x128xf32>
      %c0_36 = arith.constant 0 : index
      %c0_37 = arith.constant 0 : index
      %49 = vector.load %arg9[%c0_36, %c0_37] : memref<128x128xf32, #tpu.memory_space<vmem>>, vector<128x128xf32>
      %cst_38 = arith.constant dense<0.000000e+00> : vector<2x128xf32>
      %50 = tpu.matmul %48, %49, %cst_38 {dimension_numbers = #tpu.dot_dimension_numbers<[1], [0], [0], [1], [0, 0, 1, 1], [], []>} : vector<2x128xf32>, vector<128x128xf32>, vector<2x128xf32> -> vector<2x128xf32>
      %c0_39 = arith.constant 0 : index
      %c0_40 = arith.constant 0 : index
      %51 = vector.load %arg10[%c0_39, %c0_40] : memref<1x128xf32, #tpu.memory_space<vmem>>, vector<1x128xf32>
      %52 = vector.broadcast %51 : vector<1x128xf32> to vector<2x128xf32>
      %53 = arith.addf %50, %52 : vector<2x128xf32>
      %c0_41 = arith.constant 0 : index
      %c0_42 = arith.constant 0 : index
      %54 = vector.load %arg11[%c0_41, %c0_42] : memref<2x128xf32, #tpu.memory_space<vmem>>, vector<2x128xf32>
      tpu.vector_store %arg11[%c0_41, %c0_42], %53 {strides = array<i32>} : memref<2x128xf32, #tpu.memory_space<vmem>>, vector<2x128xf32>,
    } else {
    }
    return
  }
  func.func @transform_0(%arg0: i32, %arg1: i32) -> (i32, i32, i32) {
    %c0_i32 = arith.constant 0 : i32
    %c0_i32_0 = arith.constant 0 : i32
    return %arg0, %arg1, %c0_i32 : i32, i32, i32
  }
  func.func @transform_1(%arg0: i32, %arg1: i32) -> (i32, i32, i32) {
    %c0_i32 = arith.constant 0 : i32
    %c0_i32_0 = arith.constant 0 : i32
    return %arg0, %arg1, %c0_i32 : i32, i32, i32
  }
  func.func @transform_2(%arg0: i32, %arg1: i32) -> (i32, i32) {
    %c0_i32 = arith.constant 0 : i32
    %c0_i32_0 = arith.constant 0 : i32
    %c0_i32_1 = arith.constant 0 : i32
    return %c0_i32, %c0_i32_0 : i32, i32
  }
  func.func @transform_3(%arg0: i32, %arg1: i32) -> (i32, i32) {
    %c0_i32 = arith.constant 0 : i32
    %c0_i32_0 = arith.constant 0 : i32
    %c0_i32_1 = arith.constant 0 : i32
    return %c0_i32, %c0_i32_0 : i32, i32
  }
  func.func @transform_4(%arg0: i32, %arg1: i32) -> (i32, i32) {
    %c0_i32 = arith.constant 0 : i32
    %c0_i32_0 = arith.constant 0 : i32
    %c0_i32_1 = arith.constant 0 : i32
    return %c0_i32, %c0_i32_0 : i32, i32
  }
  func.func @transform_5(%arg0: i32, %arg1: i32) -> (i32, i32) {
    %c0_i32 = arith.constant 0 : i32
    %c0_i32_0 = arith.constant 0 : i32
    %c0_i32_1 = arith.constant 0 : i32
    return %c0_i32, %c0_i32_0 : i32, i32
  }
  func.func @transform_6(%arg0: i32, %arg1: i32) -> (i32, i32) {
    %c0_i32 = arith.constant 0 : i32
    %c0_i32_0 = arith.constant 0 : i32
    %c0_i32_1 = arith.constant 0 : i32
    return %c0_i32, %c0_i32_0 : i32, i32
  }
  func.func @transform_7(%arg0: i32, %arg1: i32) -> (i32, i32) {
    %c0_i32 = arith.constant 0 : i32
    %c0_i32_0 = arith.constant 0 : i32
    %c0_i32_1 = arith.constant 0 : i32
    return %c0_i32, %c0_i32_0 : i32, i32
  }
  func.func @transform_8(%arg0: i32, %arg1: i32) -> (i32, i32) {
    %c0_i32 = arith.constant 0 : i32
    %c0_i32_0 = arith.constant 0 : i32
    %c0_i32_1 = arith.constant 0 : i32
    return %c0_i32, %c0_i32_0 : i32, i32
  }
  func.func @transform_9(%arg0: i32, %arg1: i32) -> (i32, i32) {
    %c0_i32 = arith.constant 0 : i32
    %c0_i32_0 = arith.constant 0 : i32
    return %arg0, %c0_i32 : i32, i32
  }
}

</mosaic_0001>

<bundles_post_ra>
// kernel: tpu_custom_call.1
= control target key start
LH: loop header
LB: loop body
LE: loop exit
PB: predicated region body
PF: predicated region fallthrough
CT: control target
= control target key end

     0   :  { %14 = vsyncpa [#allocation5], 0  ;;  %s1162_s0 = inlined_call_operand.hbm [shape: f32[2,2,128], index: 0, kind: input, shape index: {}]   ;;  %s1163_s1 = inlined_call_operand.hbm [shape: f32[2,2,128], index: 1, kind: input, shape index: {}]   ;;  %s1164_s2 = inlined_call_operand.hbm [shape: f32[32,128], index: 2, kind: input, shape index: {}]   ;;  %s1165_s3 = inlined_call_operand.hbm [shape: f32[32,128], index: 3, kind: input, shape index: {}]   ;;  %s1166_s4 = inlined_call_operand.vmem [shape: f32[1,128], index: 4, kind: input, shape index: {}]   ;;  %s1167_s5 = inlined_call_operand.hbm [shape: f32[128,128], index: 5, kind: input, shape index: {}]   ;;  %s1168_s6 = inlined_call_operand.vmem [shape: f32[1,128], index: 6, kind: input, shape index: {}]   ;;  %s1169_s7 = inlined_call_operand.hbm [shape: f32[128,128], index: 7, kind: input, shape index: {}]   ;;  %s1170_s8 = inlined_call_operand.vmem [shape: f32[1,128], index: 8, kind: input, shape index: {}]   ;;  %s1171_s9 = inlined_call_operand.hbm [shape: f32[2,128], index: 9, kind: output, shape index: {}]  }
   0x1   :  { %15 = vsyncpa [#allocation8], 0 }
   0x2   :  { %16 = vsyncpa [#allocation11], 0 }
   0x3   :  { %17 = vsyncpa [#allocation14], 0 }
   0x4   :  { %18 = vsyncpa [#allocation6], 0  ;;  %s951_s30 = smov [#allocation7]   ;;  %s787_s13 = scalar_lea.hbm %s1163_s1, 64 }
   0x5   :  { %s36_s10 = sshll.u32 %s951_s30, 4  ;;  %p788_p0 = scmp.ne.s32.totalorder %s1163_s1, %s787_s13  ;;  %s37_s10 = int_to_ptr.vmem [resolvable:$true] %s36_s10 }
   0x6   :  { %p791_p1 = scmp.lt.u32.totalorder %s787_s13, %s1163_s1 }
   0x8   :  { %p793_p2 = pnand %p791_p1, %p788_p0 }
   0xa   :  { %796 = shalt.err (!%p793_p2)
}
   0xb   :  { %s797_s18 = scalar_lea.vmem %s37_s10, 64  ;;  %p802_p4 = scmp.lt.s32.totalorder %s37_s10, %s37_s10 }
   0xc   :  { %p798_p3 = scmp.ne.s32.totalorder %s37_s10, %s797_s18  ;;  %p803_p5 = scmp.lt.s32.totalorder %s797_s18, %s797_s18 }
   0xe   :  { %p804_p6 = por %p803_p5, %p802_p4 }
  0x10   :  { %p805_p7 = pnand %p804_p6, %p798_p3 }
  0x12   :  { %808 = shalt.err (!%p805_p7)
}
  0x13   :  { %s952_s19 = smov 32   ;;  %s953_s20 = smov 2  }
  0x14   :  { %42 = dma.hbm_to_vmem [thread:$0]  %s1163_s1, 64, %s37_s10, [#allocation8], %s952_s19, %s952_s19, %s953_s20  }
  0x15   :  { %s954_s23 = smov [#allocation10]   ;;  %s955_s25 = smov [#allocation4]  }
  0x16   :  { %s60_s24 = sshll.u32 %s954_s23, 4  ;;  %s24_s26 = sshll.u32 %s955_s25, 4  ;;  %s61_s24 = int_to_ptr.vmem [resolvable:$true] %s60_s24  ;;  %s25_s26 = int_to_ptr.vmem [resolvable:$true] %s24_s26 }
  0x17   :  { %s809_s29 = scalar_lea.hbm %s1165_s3, 512 }
  0x18   :  { %p810_p8 = scmp.ne.s32.totalorder %s1165_s3, %s809_s29  ;;  %p813_p9 = scmp.lt.u32.totalorder %s809_s29, %s1165_s3 }
  0x1a   :  { %p815_p10 = pnand %p813_p9, %p810_p8 }
  0x1c   :  { %818 = shalt.err (!%p815_p10)
}
  0x1d   :  { %s819_s1 = scalar_lea.vmem %s61_s24, 512  ;;  %p824_p12 = scmp.lt.s32.totalorder %s61_s24, %s61_s24 }
  0x1e   :  { %p820_p11 = scmp.ne.s32.totalorder %s61_s24, %s819_s1  ;;  %p825_p13 = scmp.lt.s32.totalorder %s819_s1, %s819_s1 }
  0x20   :  { %p826_p0 = por %p825_p13, %p824_p12 }
  0x22   :  { %p827_p1 = pnand %p826_p0, %p820_p11 }
  0x24   :  { %830 = shalt.err (!%p827_p1)
}
  0x25   :  { %s956_s10 = smov 128   ;;  %s957_s14 = smov 8  }
  0x26   :  { %66 = dma.hbm_to_vmem [thread:$0]  %s1165_s3, 512, %s61_s24, [#allocation11], %s956_s10, %s956_s10, %s957_s14  }
  0x27   :  { %s831_s21 = scalar_lea.hbm %s1162_s0, 64 }
  0x28   :  { %p832_p2 = scmp.ne.s32.totalorder %s1162_s0, %s831_s21  ;;  %p835_p3 = scmp.lt.u32.totalorder %s831_s21, %s1162_s0 }
  0x2a   :  { %p837_p4 = pnand %p835_p3, %p832_p2 }
  0x2c   :  { %840 = shalt.err (!%p837_p4)
}
  0x2d   :  { %s841_s28 = scalar_lea.vmem %s25_s26, 64  ;;  %p846_p6 = scmp.lt.s32.totalorder %s25_s26, %s25_s26 }
  0x2e   :  { %p842_p5 = scmp.ne.s32.totalorder %s25_s26, %s841_s28  ;;  %p847_p7 = scmp.lt.s32.totalorder %s841_s28, %s841_s28 }
  0x30   :  { %p848_p8 = por %p847_p7, %p846_p6 }
  0x32   :  { %p849_p9 = pnand %p848_p8, %p842_p5 }
  0x34   :  { %852 = shalt.err (!%p849_p9)
}
  0x35   :  { %30 = dma.hbm_to_vmem [thread:$0]  %s1162_s0, 64, %s25_s26, [#allocation5], %s952_s19, %s952_s19, %s953_s20  }
  0x36   :  { %s958_s29 = smov [#allocation9]   ;;  %s959_s11 = smov [#allocation12]  }
  0x37   :  { %s48_s30 = sshll.u32 %s958_s29, 4  ;;  %s74_s12 = sshll.u32 %s959_s11, 4  ;;  %s49_s30 = int_to_ptr.vmem [resolvable:$true] %s48_s30  ;;  %s75_s12 = int_to_ptr.vmem [resolvable:$true] %s74_s12 }
  0x38   :  { %s853_s15 = scalar_lea.hbm %s1164_s2, 512 }
  0x39   :  { %p854_p10 = scmp.ne.s32.totalorder %s1164_s2, %s853_s15  ;;  %p857_p11 = scmp.lt.u32.totalorder %s853_s15, %s1164_s2 }
  0x3b   :  { %p859_p12 = pnand %p857_p11, %p854_p10 }
  0x3d   :  { %862 = shalt.err (!%p859_p12)
}
  0x3e   :  { %s863_s0 = scalar_lea.vmem %s49_s30, 512  ;;  %p868_p0 = scmp.lt.s32.totalorder %s49_s30, %s49_s30 }
  0x3f   :  { %p864_p13 = scmp.ne.s32.totalorder %s49_s30, %s863_s0  ;;  %p869_p1 = scmp.lt.s32.totalorder %s863_s0, %s863_s0 }
  0x41   :  { %p870_p2 = por %p869_p1, %p868_p0 }
  0x43   :  { %p871_p3 = pnand %p870_p2, %p864_p13 }
  0x45   :  { %874 = shalt.err (!%p871_p3)
}
  0x46   :  { %54 = dma.hbm_to_vmem [thread:$0]  %s1164_s2, 512, %s49_s30, [#allocation8], %s956_s10, %s956_s10, %s957_s14  }
  0x47   :  { %s875_s25 = scalar_lea.hbm %s1167_s5, 2048 }
  0x48   :  { %p876_p4 = scmp.ne.s32.totalorder %s1167_s5, %s875_s25  ;;  %p879_p5 = scmp.lt.u32.totalorder %s875_s25, %s1167_s5 }
  0x4a   :  { %p881_p6 = pnand %p879_p5, %p876_p4 }
  0x4c   :  { %884 = shalt.err (!%p881_p6)
}
  0x4d   :  { %s885_s29 = scalar_lea.vmem %s75_s12, 2048  ;;  %p890_p8 = scmp.lt.s32.totalorder %s75_s12, %s75_s12 }
  0x4e   :  { %p886_p7 = scmp.ne.s32.totalorder %s75_s12, %s885_s29  ;;  %p891_p9 = scmp.lt.s32.totalorder %s885_s29, %s885_s29 }
  0x50   :  { %p892_p10 = por %p891_p9, %p890_p8 }
  0x52   :  { %p893_p11 = pnand %p892_p10, %p886_p7 }
  0x54   :  { %896 = shalt.err (!%p893_p11)
}
  0x55   :  { %80 = dma.hbm_to_vmem [thread:$0]  %s1167_s5, 2048, %s75_s12, [#allocation11], %s956_s10, %s956_s10, %s957_s14  }
  0x56   :  { %s960_s11 = smov [#allocation13]   ;;  %s897_s16 = scalar_lea.hbm %s1169_s7, 2048 }
  0x57   :  { %s88_s13 = sshll.u32 %s960_s11, 4  ;;  %p898_p12 = scmp.ne.s32.totalorder %s1169_s7, %s897_s16  ;;  %s89_s13 = int_to_ptr.vmem [resolvable:$true] %s88_s13 }
  0x58   :  { %p901_p13 = scmp.lt.u32.totalorder %s897_s16, %s1169_s7 }
  0x5a   :  { %p903_p0 = pnand %p901_p13, %p898_p12 }
  0x5c   :  { %906 = shalt.err (!%p903_p0)
}
  0x5d   :  { %s907_s20 = scalar_lea.vmem %s89_s13, 2048  ;;  %p912_p2 = scmp.lt.s32.totalorder %s89_s13, %s89_s13 }
  0x5e   :  { %p908_p1 = scmp.ne.s32.totalorder %s89_s13, %s907_s20  ;;  %p913_p3 = scmp.lt.s32.totalorder %s907_s20, %s907_s20 }
  0x60   :  { %p914_p4 = por %p913_p3, %p912_p2 }
  0x62   :  { %p915_p5 = pnand %p914_p4, %p908_p1 }
  0x64   :  { %918 = shalt.err (!%p915_p5)
}
  0x65   :  { %94 = dma.hbm_to_vmem [thread:$0]  %s1169_s7, 2048, %s89_s13, [#allocation14], %s956_s10, %s956_s10, %s957_s14  }
  0x66   :  { %941 = dma.done.wait [#allocation5], 64  }
  0x67   :  { %942 = vsyncadd [#allocation5], 4294967232 }
  0x68   :  { %943 = dma.done.wait [#allocation8], 576  }
  0x69   :  { %944 = vsyncadd [#allocation8], 4294966720 }
  0x6a   :  { %945 = dma.done.wait [#allocation11], 2560  }
  0x6b   :  { %946 = vsyncadd [#allocation11], 4294964736 }
  0x6c   :  { %947 = dma.done.wait [#allocation14], 2048  }
  0x6d   :  { %948 = vsyncadd [#allocation14], 4294965248  ;;  %v961_v0 = vmov 0.0   ;;  %vm126_vm0 = vcmask 1041408   ;;  %v121_v1 = vld [vmem:[#allocation4] sm:$0x3] }
  0x6e   :  { %119 = vst [vmem:[#allocation2] sm:$0x3] %v961_v0  ;;  %120 = vst [vmem:[#allocation3] sm:$0x3] %v961_v0  ;;  %v122_v2 = vld [vmem:[#allocation4 + $0x2] sm:$0x3] }
  0x6f   :  { %v123_v3 = vld [vmem:[#allocation7] sm:$0x3]  ;;  %v127_v4 = vsel %vm126_vm0, %v121_v1, 0.0  ;;  %v134_v5 = vsel %vm126_vm0, %v122_v2, 0.0  ;;  %v124_v6 = vld [vmem:[#allocation7 + $0x2] sm:$0x3] }
  0x70   :  { %v128_v7 = vrot.slane %v127_v4, 4  ;;  %v135_v8 = vrot.slane %v134_v5, 4  ;;  %v149_v9 = vsel %vm126_vm0, %v123_v3, 0.0  ;;  %v156_v10 = vsel %vm126_vm0, %v124_v6, 0.0  ;;  %v204_v32 = vld [vmem:[#allocation10] sm:$0xff]  ;;  %v205_v33 = vld [vmem:[#allocation10 + $0x8] sm:$0xff] }
  0x71   :  { %v150_v11 = vrot.slane %v149_v9, 4  ;;  %v157_v12 = vrot.slane %v156_v10, 4  ;;  %vm143_vm1 = vcmask 1041409   ;;  %v200_v34 = vld [vmem:[#allocation9] sm:$0xff]  ;;  %v962_v38 = vmov 0.0|0.0   ;;  %v201_v40 = vld [vmem:[#allocation9 + $0x8] sm:$0xff] }
  0x72   :  { %v129_v13 = vadd.f32 %v128_v7, %v127_v4  ;;  %v136_v14 = vadd.f32 %v135_v8, %v134_v5  ;;  %711 = vmatprep.subr.bf16.mxu0 %v962_v38  ;;  %717 = vmatprep.subr.bf16.mxu1 %v962_v38  ;;  %v712_v39 = vpack.c.bf16 %v205_v33, %v204_v32  ;;  %v206_v46 = vld [vmem:[#allocation10 + $0x10] sm:$0xff]  ;;  %v207_v47 = vld [vmem:[#allocation10 + $0x18] sm:$0xff]  ;;  %vm963_vm2 = vmmov 0   ;;  %s964_s7 = smov 64   ;;  %s965_s10 = smov 96   ;;  %v364_v60 = vld [vmem:[#allocation12] sm:$0xff] }
  0x73   :  { %v151_v15 = vadd.f32 %v150_v11, %v149_v9  ;;  %v158_v16 = vadd.f32 %v157_v12, %v156_v10  ;;  %v718_v42 = vpack.c.bf16 %v201_v40, %v200_v34  ;;  %v202_v48 = vld [vmem:[#allocation9 + $0x10] sm:$0xff]  ;;  %v715_v49 = vpack.c.bf16 %v207_v47, %v206_v46  ;;  %v203_v50 = vld [vmem:[#allocation9 + $0x18] sm:$0xff]  ;;  %627 = vmatprep.mubr.msk.f32.mxu0 %vm963_vm2, %v961_v0  ;;  %v365_v61 = vld [vmem:[#allocation12 + $0x8] sm:$0xff]  ;;  %s966_s25 = smov [#allocation15]  }
  0x74   :  { %v130_v17 = vrot.slane %v129_v13, 2  ;;  %v137_v18 = vrot.slane %v136_v14, 2  ;;  %713 = vmatpush3.bf16.msra.mxu0 %v712_v39  ;;  %v721_v51 = vpack.c.bf16 %v203_v50, %v202_v48  ;;  %638 = vmatprep.mubr.msk.f32.mxu1 %vm963_vm2, %v961_v0  ;;  %vm208_vm3 = vcmask 261120   ;;  %v366_v6 = vld [vmem:[#allocation12 + $0x10] sm:$0xff]  ;;  %v367_v7 = vld [vmem:[#allocation12 + $0x18] sm:$0xff]  ;;  %v368_v9 = vld [vmem:[#allocation12 + $0x20] sm:$0xff] }
  0x75   :  { %v152_v19 = vrot.slane %v151_v15, 2  ;;  %v159_v20 = vrot.slane %v158_v16, 2  ;;  %v125_v27 = vld [vmem:[#allocation2] sm:$0x3]  ;;  %v148_v35 = vld [vmem:[#allocation3] sm:$0x3]  ;;  %719 = vmatpush3.bf16.msra.mxu1 %v718_v42  ;;  %714 = vmatprep.subr.bf16.mxu0 %v962_v38  ;;  %v724_v3 = vpack.c.bf16 %v365_v61, %v364_v60  ;;  %v727_v8 = vpack.c.bf16 %v367_v7, %v366_v6 }
  0x76   :  { %v131_v21 = vadd.f32 %v130_v17, %v129_v13  ;;  %v138_v22 = vadd.f32 %v137_v18, %v136_v14  ;;  %720 = vmatprep.subr.bf16.mxu1 %v962_v38  ;;  %v369_v10 = vld [vmem:[#allocation12 + $0x28] sm:$0xff]  ;;  %v370_v12 = vld [vmem:[#allocation12 + $0x30] sm:$0xff]  ;;  %v371_v13 = vld [vmem:[#allocation12 + $0x38] sm:$0xff]  ;;  %s558_s27 = sshll.u32 %s966_s25, 4  ;;  %s559_s27 = int_to_ptr.vmem [resolvable:$true] %s558_s27 }
  0x77   :  { %v153_v23 = vadd.f32 %v152_v19, %v151_v15  ;;  %v160_v24 = vadd.f32 %v159_v20, %v158_v16  ;;  %v730_v11 = vpack.c.bf16 %v369_v10, %v368_v9  ;;  %v733_v14 = vpack.c.bf16 %v371_v13, %v370_v12  ;;  %v372_v15 = vld [vmem:[#allocation12 + $0x40] sm:$0xff]  ;;  %v373_v16 = vld [vmem:[#allocation12 + $0x48] sm:$0xff]  ;;  %v374_v18 = vld [vmem:[#allocation12 + $0x50] sm:$0xff]  ;;  %s919_s28 = scalar_lea.vmem %s559_s27, 32  ;;  %p924_p7 = scmp.lt.s32.totalorder %s559_s27, %s559_s27 }
  0x78   :  { %v132_v25 = vrot.slane %v131_v21, 1  ;;  %v139_v26 = vrot.slane %v138_v22, 1  ;;  %716 = vmatpush3.bf16.msra.mxu0 %v715_v49  ;;  %v736_v17 = vpack.c.bf16 %v373_v16, %v372_v15  ;;  %v375_v19 = vld [vmem:[#allocation12 + $0x58] sm:$0xff]  ;;  %v376_v20 = vld [vmem:[#allocation12 + $0x60] sm:$0xff]  ;;  %v463_v33 = vld [vmem:[#allocation13 + $0x28] sm:$0xff]  ;;  %p920_p6 = scmp.ne.s32.totalorder %s559_s27, %s919_s28  ;;  %p925_p8 = scmp.lt.s32.totalorder %s919_s28, %s919_s28 }
  0x79   :  { %v154_v28 = vrot.slane %v153_v23, 1  ;;  %v161_v29 = vrot.slane %v160_v24, 1  ;;  %722 = vmatpush3.bf16.msra.mxu1 %v721_v51  ;;  %723 = vmatprep.subr.bf16.mxu0 %v962_v38  ;;  %v462_v32 = vld [vmem:[#allocation13 + $0x20] sm:$0xff]  ;;  %v467_v40 = vld [vmem:[#allocation13 + $0x48] sm:$0xff]  ;;  %v468_v42 = vld [vmem:[#allocation13 + $0x50] sm:$0xff] }
  0x7a   :  { %v133_v30 = vadd.f32 %v132_v25, %v131_v21  ;;  %v140_v31 = vadd.f32 %v139_v26, %v138_v22  ;;  %747 = vmatprep.subr.bf16.mxu1 %v962_v38  ;;  %v377_v21 = vld [vmem:[#allocation12 + $0x68] sm:$0xff]  ;;  %v458_v26 = vld [vmem:[#allocation13] sm:$0xff]  ;;  %v754_v34 = vpack.c.bf16 %v463_v33, %v462_v32  ;;  %v572_v50 = vld [vmem:[%s1166_s4] ss:$0 sm:$0xff]  ;;  %p926_p9 = por %p925_p8, %p924_p7 }
  0x7b   :  { %v155_v36 = vadd.f32 %v154_v28, %v153_v23  ;;  %v162_v37 = vadd.f32 %v161_v29, %v160_v24  ;;  %v742_v22 = vpack.c.bf16 %v377_v21, %v376_v20  ;;  %v378_v23 = vld [vmem:[#allocation12 + $0x70] sm:$0xff]  ;;  %v379_v24 = vld [vmem:[#allocation12 + $0x78] sm:$0xff]  ;;  %v466_v39 = vld [vmem:[#allocation13 + $0x40] sm:$0xff] }
  0x7c   :  { %v144_v41 = vsel %vm143_vm1, %v140_v31, %v133_v30  ;;  %v745_v25 = vpack.c.bf16 %v379_v24, %v378_v23  ;;  %v460_v28 = vld [vmem:[#allocation13 + $0x10] sm:$0xff]  ;;  %v461_v30 = vld [vmem:[#allocation13 + $0x18] sm:$0xff]  ;;  %v471_v46 = vld [vmem:[#allocation13 + $0x68] sm:$0xff]  ;;  %p927_p10 = pnand %p926_p9, %p920_p6 }
  0x7d   :  { %v146_v43 = vadd.f32 %v144_v41, %v125_v27  ;;  %v165_v44 = vsel %vm143_vm1, %v162_v37, %v155_v36  ;;  %v459_v27 = vld [vmem:[#allocation13 + $0x8] sm:$0xff]  ;;  %v751_v31 = vpack.c.bf16 %v461_v30, %v460_v28  ;;  %v465_v36 = vld [vmem:[#allocation13 + $0x38] sm:$0xff]  ;;  %v760_v41 = vpack.c.bf16 %v467_v40, %v466_v39 }
  0x7e   :  { %v167_v45 = vadd.f32 %v165_v44, %v148_v35  ;;  %v748_v29 = vpack.c.bf16 %v459_v27, %v458_v26  ;;  %v464_v35 = vld [vmem:[#allocation13 + $0x30] sm:$0xff] }
  0x7f   :  { %147 = vst [vmem:[#allocation2] sm:$0x3] %v146_v43  ;;  %v757_v37 = vpack.c.bf16 %v465_v36, %v464_v35  ;;  %v469_v43 = vld [vmem:[#allocation13 + $0x58] sm:$0xff] }
  0x80   :  { %168 = vst [vmem:[#allocation3] sm:$0x3] %v167_v45  ;;  %v763_v44 = vpack.c.bf16 %v469_v43, %v468_v42  ;;  %v470_v45 = vld [vmem:[#allocation13 + $0x60] sm:$0xff] }
  0x81   :  { %v766_v47 = vpack.c.bf16 %v471_v46, %v470_v45 }
  0x86   :  { %v172_v52 = vld [vmem:[#allocation2] sm:$0x3] }
  0x87   :  { %184 = vrot.lane.b32.xlu1 %v172_v52, %s964_s7  ;;  %175 = vrot.lane.b32.xlu0 %v172_v52, %s965_s10  ;;  %v173_v53 = vld [vmem:[#allocation3] sm:$0x3] }
  0x8b   :  { %188 = vrot.lane.b32.xlu1 %v173_v53, %s964_s7  ;;  %180 = vrot.lane.b32.xlu0 %v173_v53, %s965_s10 }
  0x8f   :  { %196 = vrot.lane.b32.xlu1 %v173_v53, %s952_s19  ;;  %192 = vrot.lane.b32.xlu0 %v172_v52, %s952_s19 }
  0xf9   :  { %v185_v54 = vpop.permute.xlu1 %184  ;;  %v176_v55 = vpop.permute.xlu0 %175 }
  0xfa   :  { %v178_v56 = vadd.f32 %v176_v55, %v172_v52 }
  0xfc   :  { %v187_v63 = vadd.f32 %v185_v54, %v178_v56  ;;  %v472_v56 = vld [vmem:[#allocation13 + $0x70] sm:$0xff] }
  0xfd   :  { %v189_v57 = vpop.permute.xlu1 %188  ;;  %v181_v58 = vpop.permute.xlu0 %180 }
  0xfe   :  { %v183_v59 = vadd.f32 %v181_v58, %v173_v53 }
 0x100   :  { %v191_v62 = vadd.f32 %v189_v57, %v183_v59  ;;  %v473_v57 = vld [vmem:[#allocation13 + $0x78] sm:$0xff] }
 0x101   :  { %v197_v1 = vpop.permute.xlu1 %196  ;;  %v193_v2 = vpop.permute.xlu0 %192  ;;  %v769_v58 = vpack.c.bf16 %v473_v57, %v472_v56 }
 0x102   :  { %v199_v4 = vadd.f32 %v197_v1, %v191_v62  ;;  %v195_v5 = vadd.f32 %v193_v2, %v187_v63  ;;  %v574_v63 = vld [vmem:[%s1170_s8] ss:$0 sm:$0xff] }
 0x104   :  { %628 = vmatmul.mubr.msk.f32.vlgmr.msra.gmra.mrb[0].mxu0 %vm208_vm3, %v199_v4  ;;  %639 = vmatmul.mubr.msk.f32.vlgmr.msra.gmra.mrb[0].mxu1 %vm208_vm3, %v195_v5 }
 0x105   :  { %725 = vmatpush3.bf16.msra.mxu0 %v724_v3  ;;  %673 = vmatprep.mubr.msk.f32.mxu0 %vm963_vm2, %v961_v0 }
 0x106   :  { %726 = vmatprep.subr.bf16.mxu0 %v962_v38  ;;  %708 = vmatprep.mubr.msk.f32.mxu1 %vm963_vm2, %v961_v0  ;;  %v739_v0 = vpack.c.bf16 %v375_v19, %v374_v18 }
 0x107   :  { %749 = vmatpush3.bf16.msra.mxu1 %v748_v29 }
 0x108   :  { %750 = vmatprep.subr.bf16.mxu1 %v962_v38 }
 0x109   :  { %728 = vmatpush3.bf16.msra.mxu0 %v727_v8 }
 0x10a   :  { %729 = vmatprep.subr.bf16.mxu0 %v962_v38 }
 0x10b   :  { %752 = vmatpush3.bf16.msra.mxu1 %v751_v31 }
 0x10c   :  { %753 = vmatprep.subr.bf16.mxu1 %v962_v38 }
 0x10d   :  { %731 = vmatpush3.bf16.msra.mxu0 %v730_v11 }
 0x10e   :  { %732 = vmatprep.subr.bf16.mxu0 %v962_v38 }
 0x10f   :  { %755 = vmatpush3.bf16.msra.mxu1 %v754_v34 }
 0x110   :  { %756 = vmatprep.subr.bf16.mxu1 %v962_v38 }
 0x111   :  { %734 = vmatpush3.bf16.msra.mxu0 %v733_v14 }
 0x112   :  { %735 = vmatprep.subr.bf16.mxu0 %v962_v38 }
 0x113   :  { %758 = vmatpush3.bf16.msra.mxu1 %v757_v37 }
 0x114   :  { %759 = vmatprep.subr.bf16.mxu1 %v962_v38 }
 0x115   :  { %737 = vmatpush3.bf16.msra.mxu0 %v736_v17 }
 0x116   :  { %738 = vmatprep.subr.bf16.mxu0 %v962_v38 }
 0x117   :  { %761 = vmatpush3.bf16.msra.mxu1 %v760_v41 }
 0x118   :  { %762 = vmatprep.subr.bf16.mxu1 %v962_v38 }
 0x119   :  { %740 = vmatpush3.bf16.msra.mxu0 %v739_v0 }
 0x11a   :  { %741 = vmatprep.subr.bf16.mxu0 %v962_v38 }
 0x11b   :  { %764 = vmatpush3.bf16.msra.mxu1 %v763_v44 }
 0x11c   :  { %765 = vmatprep.subr.bf16.mxu1 %v962_v38 }
 0x11d   :  { %743 = vmatpush3.bf16.msra.mxu0 %v742_v22 }
 0x11e   :  { %744 = vmatprep.subr.bf16.mxu0 %v962_v38 }
 0x11f   :  { %767 = vmatpush3.bf16.msra.mxu1 %v766_v47 }
 0x120   :  { %768 = vmatprep.subr.bf16.mxu1 %v962_v38  ;;  %v573_v38 = vld [vmem:[%s1168_s6] ss:$0 sm:$0xff] }
 0x121   :  { %746 = vmatpush3.bf16.msra.mxu0 %v745_v25 }
 0x123   :  { %770 = vmatpush3.bf16.msra.mxu1 %v769_v58 }
 0x1d7   :  { %v278_v48 = vpop.f32.mrb[0].mxu0  ;;  %v351_v49 = vpop.f32.mrb[0].mxu1 }
 0x1d8   :  { %v352_v51 = vadd.f32 %v351_v49, %v278_v48  ;;  %v629_v52 = vpop.f32.mrb[1].mxu0  ;;  %v640_v53 = vpop.f32.mrb[1].mxu1 }
 0x1da   :  { %v362_v54 = vadd.f32 %v572_v50, %v352_v51 }
 0x1dc   :  { %v363_v55 = vmax.f32 %v362_v54, 0.0 }
 0x1de   :  { %674 = vmatmul.mubr.f32.vlgmr.msra.gmra.mrb[2].mxu0 %v363_v55 }
 0x2b1   :  { %v453_v59 = vpop.f32.mrb[2].mxu0 }
 0x2b2   :  { %v454_v60 = vadd.f32 %v573_v38, %v453_v59  ;;  %v675_v61 = vpop.f32.mrb[3].mxu0 }
 0x2b4   :  { %v457_v62 = vmax.f32 %v454_v60, 0.0 }
 0x2b6   :  { %709 = vmatmul.mubr.f32.vlgmr.msra.gmra.mrb[2].mxu1 %v457_v62 }
 0x389   :  { %v547_v1 = vpop.f32.mrb[2].mxu1 }
 0x38a   :  { %v548_v2 = vadd.f32 %v574_v63, %v547_v1  ;;  %v710_v3 = vpop.f32.mrb[3].mxu1 }
 0x38c   :  { %551 = vst [vmem:[#allocation15] sm:$0x3] %v548_v2 }
 0x38d   :  { %930 = shalt.err (!%p927_p10)
}
 0x38e   :  { %s931_s24 = scalar_lea.hbm %s1171_s9, 32 }
 0x38f   :  { %p932_p11 = scmp.ne.s32.totalorder %s1171_s9, %s931_s24  ;;  %p935_p12 = scmp.lt.u32.totalorder %s931_s24, %s1171_s9 }
 0x391   :  { %p937_p13 = pnand %p935_p12, %p932_p11 }
 0x393   :  { %940 = shalt.err (!%p937_p13)
}
 0x394   :  { %561 = dma.vmem_to_hbm [thread:$0]  %s559_s27, 32, %s1171_s9, [#allocation6]  }
 0x395   :  { %949 = dma.done.wait [#allocation6], 32  }
 0x396   :  { %950 = vsyncadd [#allocation6], 4294967264 }
 0x397   :  { %565 = vsyncpa [#allocation5], 1 }
 0x398   :  { %566 = vsyncpa [#allocation8], 1 }
 0x399   :  { %567 = vsyncpa [#allocation11], 1 }
 0x39a   :  { %568 = vsyncpa [#allocation14], 1 }
 0x39b   :  { %569 = vsyncpa [#allocation6], 1 }

// kernel: tpu_custom_call.1
= control target key start
LH: loop header
LB: loop body
LE: loop exit
PB: predicated region body
PF: predicated region fallthrough
CT: control target
= control target key end

     0   :  { %14 = vsyncpa [#allocation5], 0  ;;  %s1162_s0 = inlined_call_operand.hbm [shape: f32[2,2,128], index: 0, kind: input, shape index: {}]   ;;  %s1163_s1 = inlined_call_operand.hbm [shape: f32[2,2,128], index: 1, kind: input, shape index: {}]   ;;  %s1164_s2 = inlined_call_operand.hbm [shape: f32[32,128], index: 2, kind: input, shape index: {}]   ;;  %s1165_s3 = inlined_call_operand.hbm [shape: f32[32,128], index: 3, kind: input, shape index: {}]   ;;  %s1166_s4 = inlined_call_operand.vmem [shape: f32[1,128], index: 4, kind: input, shape index: {}]   ;;  %s1167_s5 = inlined_call_operand.hbm [shape: f32[128,128], index: 5, kind: input, shape index: {}]   ;;  %s1168_s6 = inlined_call_operand.vmem [shape: f32[1,128], index: 6, kind: input, shape index: {}]   ;;  %s1169_s7 = inlined_call_operand.hbm [shape: f32[128,128], index: 7, kind: input, shape index: {}]   ;;  %s1170_s8 = inlined_call_operand.vmem [shape: f32[1,128], index: 8, kind: input, shape index: {}]   ;;  %s1171_s9 = inlined_call_operand.hbm [shape: f32[2,128], index: 9, kind: output, shape index: {}]  }
   0x1   :  { %15 = vsyncpa [#allocation8], 0 }
   0x2   :  { %16 = vsyncpa [#allocation11], 0 }
   0x3   :  { %17 = vsyncpa [#allocation14], 0 }
   0x4   :  { %18 = vsyncpa [#allocation6], 0  ;;  %s951_s30 = smov [#allocation7]   ;;  %s787_s13 = scalar_lea.hbm %s1163_s1, 64 }
   0x5   :  { %s36_s10 = sshll.u32 %s951_s30, 4  ;;  %p788_p0 = scmp.ne.s32.totalorder %s1163_s1, %s787_s13  ;;  %s37_s10 = int_to_ptr.vmem [resolvable:$true] %s36_s10 }
   0x6   :  { %p791_p1 = scmp.lt.u32.totalorder %s787_s13, %s1163_s1 }
   0x8   :  { %p793_p2 = pnand %p791_p1, %p788_p0 }
   0xa   :  { %796 = shalt.err (!%p793_p2)
}
   0xb   :  { %s797_s18 = scalar_lea.vmem %s37_s10, 64  ;;  %p802_p4 = scmp.lt.s32.totalorder %s37_s10, %s37_s10 }
   0xc   :  { %p798_p3 = scmp.ne.s32.totalorder %s37_s10, %s797_s18  ;;  %p803_p5 = scmp.lt.s32.totalorder %s797_s18, %s797_s18 }
   0xe   :  { %p804_p6 = por %p803_p5, %p802_p4 }
  0x10   :  { %p805_p7 = pnand %p804_p6, %p798_p3 }
  0x12   :  { %808 = shalt.err (!%p805_p7)
}
  0x13   :  { %s952_s19 = smov 32   ;;  %s953_s20 = smov 2  }
  0x14   :  { %42 = dma.hbm_to_vmem [thread:$0]  %s1163_s1, 64, %s37_s10, [#allocation8], %s952_s19, %s952_s19, %s953_s20  }
  0x15   :  { %s954_s23 = smov [#allocation10]   ;;  %s955_s25 = smov [#allocation4]  }
  0x16   :  { %s60_s24 = sshll.u32 %s954_s23, 4  ;;  %s24_s26 = sshll.u32 %s955_s25, 4  ;;  %s61_s24 = int_to_ptr.vmem [resolvable:$true] %s60_s24  ;;  %s25_s26 = int_to_ptr.vmem [resolvable:$true] %s24_s26 }
  0x17   :  { %s809_s29 = scalar_lea.hbm %s1165_s3, 512 }
  0x18   :  { %p810_p8 = scmp.ne.s32.totalorder %s1165_s3, %s809_s29  ;;  %p813_p9 = scmp.lt.u32.totalorder %s809_s29, %s1165_s3 }
  0x1a   :  { %p815_p10 = pnand %p813_p9, %p810_p8 }
  0x1c   :  { %818 = shalt.err (!%p815_p10)
}
  0x1d   :  { %s819_s1 = scalar_lea.vmem %s61_s24, 512  ;;  %p824_p12 = scmp.lt.s32.totalorder %s61_s24, %s61_s24 }
  0x1e   :  { %p820_p11 = scmp.ne.s32.totalorder %s61_s24, %s819_s1  ;;  %p825_p13 = scmp.lt.s32.totalorder %s819_s1, %s819_s1 }
  0x20   :  { %p826_p0 = por %p825_p13, %p824_p12 }
  0x22   :  { %p827_p1 = pnand %p826_p0, %p820_p11 }
  0x24   :  { %830 = shalt.err (!%p827_p1)
}
  0x25   :  { %s956_s10 = smov 128   ;;  %s957_s14 = smov 8  }
  0x26   :  { %66 = dma.hbm_to_vmem [thread:$0]  %s1165_s3, 512, %s61_s24, [#allocation11], %s956_s10, %s956_s10, %s957_s14  }
  0x27   :  { %s831_s21 = scalar_lea.hbm %s1162_s0, 64 }
  0x28   :  { %p832_p2 = scmp.ne.s32.totalorder %s1162_s0, %s831_s21  ;;  %p835_p3 = scmp.lt.u32.totalorder %s831_s21, %s1162_s0 }
  0x2a   :  { %p837_p4 = pnand %p835_p3, %p832_p2 }
  0x2c   :  { %840 = shalt.err (!%p837_p4)
}
  0x2d   :  { %s841_s28 = scalar_lea.vmem %s25_s26, 64  ;;  %p846_p6 = scmp.lt.s32.totalorder %s25_s26, %s25_s26 }
  0x2e   :  { %p842_p5 = scmp.ne.s32.totalorder %s25_s26, %s841_s28  ;;  %p847_p7 = scmp.lt.s32.totalorder %s841_s28, %s841_s28 }
  0x30   :  { %p848_p8 = por %p847_p7, %p846_p6 }
  0x32   :  { %p849_p9 = pnand %p848_p8, %p842_p5 }
  0x34   :  { %852 = shalt.err (!%p849_p9)
}
  0x35   :  { %30 = dma.hbm_to_vmem [thread:$0]  %s1162_s0, 64, %s25_s26, [#allocation5], %s952_s19, %s952_s19, %s953_s20  }
  0x36   :  { %s958_s29 = smov [#allocation9]   ;;  %s959_s11 = smov [#allocation12]  }
  0x37   :  { %s48_s30 = sshll.u32 %s958_s29, 4  ;;  %s74_s12 = sshll.u32 %s959_s11, 4  ;;  %s49_s30 = int_to_ptr.vmem [resolvable:$true] %s48_s30  ;;  %s75_s12 = int_to_ptr.vmem [resolvable:$true] %s74_s12 }
  0x38   :  { %s853_s15 = scalar_lea.hbm %s1164_s2, 512 }
  0x39   :  { %p854_p10 = scmp.ne.s32.totalorder %s1164_s2, %s853_s15  ;;  %p857_p11 = scmp.lt.u32.totalorder %s853_s15, %s1164_s2 }
  0x3b   :  { %p859_p12 = pnand %p857_p11, %p854_p10 }
  0x3d   :  { %862 = shalt.err (!%p859_p12)
}
  0x3e   :  { %s863_s0 = scalar_lea.vmem %s49_s30, 512  ;;  %p868_p0 = scmp.lt.s32.totalorder %s49_s30, %s49_s30 }
  0x3f   :  { %p864_p13 = scmp.ne.s32.totalorder %s49_s30, %s863_s0  ;;  %p869_p1 = scmp.lt.s32.totalorder %s863_s0, %s863_s0 }
  0x41   :  { %p870_p2 = por %p869_p1, %p868_p0 }
  0x43   :  { %p871_p3 = pnand %p870_p2, %p864_p13 }
  0x45   :  { %874 = shalt.err (!%p871_p3)
}
  0x46   :  { %54 = dma.hbm_to_vmem [thread:$0]  %s1164_s2, 512, %s49_s30, [#allocation8], %s956_s10, %s956_s10, %s957_s14  }
  0x47   :  { %s875_s25 = scalar_lea.hbm %s1167_s5, 2048 }
  0x48   :  { %p876_p4 = scmp.ne.s32.totalorder %s1167_s5, %s875_s25  ;;  %p879_p5 = scmp.lt.u32.totalorder %s875_s25, %s1167_s5 }
  0x4a   :  { %p881_p6 = pnand %p879_p5, %p876_p4 }
  0x4c   :  { %884 = shalt.err (!%p881_p6)
}
  0x4d   :  { %s885_s29 = scalar_lea.vmem %s75_s12, 2048  ;;  %p890_p8 = scmp.lt.s32.totalorder %s75_s12, %s75_s12 }
  0x4e   :  { %p886_p7 = scmp.ne.s32.totalorder %s75_s12, %s885_s29  ;;  %p891_p9 = scmp.lt.s32.totalorder %s885_s29, %s885_s29 }
  0x50   :  { %p892_p10 = por %p891_p9, %p890_p8 }
  0x52   :  { %p893_p11 = pnand %p892_p10, %p886_p7 }
  0x54   :  { %896 = shalt.err (!%p893_p11)
}
  0x55   :  { %80 = dma.hbm_to_vmem [thread:$0]  %s1167_s5, 2048, %s75_s12, [#allocation11], %s956_s10, %s956_s10, %s957_s14  }
  0x56   :  { %s960_s11 = smov [#allocation13]   ;;  %s897_s16 = scalar_lea.hbm %s1169_s7, 2048 }
  0x57   :  { %s88_s13 = sshll.u32 %s960_s11, 4  ;;  %p898_p12 = scmp.ne.s32.totalorder %s1169_s7, %s897_s16  ;;  %s89_s13 = int_to_ptr.vmem [resolvable:$true] %s88_s13 }
  0x58   :  { %p901_p13 = scmp.lt.u32.totalorder %s897_s16, %s1169_s7 }
  0x5a   :  { %p903_p0 = pnand %p901_p13, %p898_p12 }
  0x5c   :  { %906 = shalt.err (!%p903_p0)
}
  0x5d   :  { %s907_s20 = scalar_lea.vmem %s89_s13, 2048  ;;  %p912_p2 = scmp.lt.s32.totalorder %s89_s13, %s89_s13 }
  0x5e   :  { %p908_p1 = scmp.ne.s32.totalorder %s89_s13, %s907_s20  ;;  %p913_p3 = scmp.lt.s32.totalorder %s907_s20, %s907_s20 }
  0x60   :  { %p914_p4 = por %p913_p3, %p912_p2 }
  0x62   :  { %p915_p5 = pnand %p914_p4, %p908_p1 }
  0x64   :  { %918 = shalt.err (!%p915_p5)
}
  0x65   :  { %94 = dma.hbm_to_vmem [thread:$0]  %s1169_s7, 2048, %s89_s13, [#allocation14], %s956_s10, %s956_s10, %s957_s14  }
  0x66   :  { %941 = dma.done.wait [#allocation5], 64  }
  0x67   :  { %942 = vsyncadd [#allocation5], 4294967232 }
  0x68   :  { %943 = dma.done.wait [#allocation8], 576  }
  0x69   :  { %944 = vsyncadd [#allocation8], 4294966720 }
  0x6a   :  { %945 = dma.done.wait [#allocation11], 2560  }
  0x6b   :  { %946 = vsyncadd [#allocation11], 4294964736 }
  0x6c   :  { %947 = dma.done.wait [#allocation14], 2048  }
  0x6d   :  { %948 = vsyncadd [#allocation14], 4294965248  ;;  %v961_v0 = vmov 0.0   ;;  %vm126_vm0 = vcmask 1041408   ;;  %v121_v1 = vld [vmem:[#allocation4] sm:$0x3] }
  0x6e   :  { %119 = vst [vmem:[#allocation2] sm:$0x3] %v961_v0  ;;  %120 = vst [vmem:[#allocation3] sm:$0x3] %v961_v0  ;;  %v122_v2 = vld [vmem:[#allocation4 + $0x2] sm:$0x3] }
  0x6f   :  { %v123_v3 = vld [vmem:[#allocation7] sm:$0x3]  ;;  %v127_v4 = vsel %vm126_vm0, %v121_v1, 0.0  ;;  %v134_v5 = vsel %vm126_vm0, %v122_v2, 0.0  ;;  %v124_v6 = vld [vmem:[#allocation7 + $0x2] sm:$0x3] }
  0x70   :  { %v128_v7 = vrot.slane %v127_v4, 4  ;;  %v135_v8 = vrot.slane %v134_v5, 4  ;;  %v149_v9 = vsel %vm126_vm0, %v123_v3, 0.0  ;;  %v156_v10 = vsel %vm126_vm0, %v124_v6, 0.0  ;;  %v204_v32 = vld [vmem:[#allocation10] sm:$0xff]  ;;  %v205_v33 = vld [vmem:[#allocation10 + $0x8] sm:$0xff] }
  0x71   :  { %v150_v11 = vrot.slane %v149_v9, 4  ;;  %v157_v12 = vrot.slane %v156_v10, 4  ;;  %vm143_vm1 = vcmask 1041409   ;;  %v200_v34 = vld [vmem:[#allocation9] sm:$0xff]  ;;  %v962_v38 = vmov 0.0|0.0   ;;  %v201_v40 = vld [vmem:[#allocation9 + $0x8] sm:$0xff] }
  0x72   :  { %v129_v13 = vadd.f32 %v128_v7, %v127_v4  ;;  %v136_v14 = vadd.f32 %v135_v8, %v134_v5  ;;  %711 = vmatprep.subr.bf16.mxu0 %v962_v38  ;;  %717 = vmatprep.subr.bf16.mxu1 %v962_v38  ;;  %v712_v39 = vpack.c.bf16 %v205_v33, %v204_v32  ;;  %v206_v46 = vld [vmem:[#allocation10 + $0x10] sm:$0xff]  ;;  %v207_v47 = vld [vmem:[#allocation10 + $0x18] sm:$0xff]  ;;  %vm963_vm2 = vmmov 0   ;;  %s964_s7 = smov 64   ;;  %s965_s10 = smov 96   ;;  %v364_v60 = vld [vmem:[#allocation12] sm:$0xff] }
  0x73   :  { %v151_v15 = vadd.f32 %v150_v11, %v149_v9  ;;  %v158_v16 = vadd.f32 %v157_v12, %v156_v10  ;;  %v718_v42 = vpack.c.bf16 %v201_v40, %v200_v34  ;;  %v202_v48 = vld [vmem:[#allocation9 + $0x10] sm:$0xff]  ;;  %v715_v49 = vpack.c.bf16 %v207_v47, %v206_v46  ;;  %v203_v50 = vld [vmem:[#allocation9 + $0x18] sm:$0xff]  ;;  %627 = vmatprep.mubr.msk.f32.mxu0 %vm963_vm2, %v961_v0  ;;  %v365_v61 = vld [vmem:[#allocation12 + $0x8] sm:$0xff]  ;;  %s966_s25 = smov [#allocation15]  }
  0x74   :  { %v130_v17 = vrot.slane %v129_v13, 2  ;;  %v137_v18 = vrot.slane %v136_v14, 2  ;;  %713 = vmatpush3.bf16.msra.mxu0 %v712_v39  ;;  %v721_v51 = vpack.c.bf16 %v203_v50, %v202_v48  ;;  %638 = vmatprep.mubr.msk.f32.mxu1 %vm963_vm2, %v961_v0  ;;  %vm208_vm3 = vcmask 261120   ;;  %v366_v6 = vld [vmem:[#allocation12 + $0x10] sm:$0xff]  ;;  %v367_v7 = vld [vmem:[#allocation12 + $0x18] sm:$0xff]  ;;  %v368_v9 = vld [vmem:[#allocation12 + $0x20] sm:$0xff] }
  0x75   :  { %v152_v19 = vrot.slane %v151_v15, 2  ;;  %v159_v20 = vrot.slane %v158_v16, 2  ;;  %v125_v27 = vld [vmem:[#allocation2] sm:$0x3]  ;;  %v148_v35 = vld [vmem:[#allocation3] sm:$0x3]  ;;  %719 = vmatpush3.bf16.msra.mxu1 %v718_v42  ;;  %714 = vmatprep.subr.bf16.mxu0 %v962_v38  ;;  %v724_v3 = vpack.c.bf16 %v365_v61, %v364_v60  ;;  %v727_v8 = vpack.c.bf16 %v367_v7, %v366_v6 }
  0x76   :  { %v131_v21 = vadd.f32 %v130_v17, %v129_v13  ;;  %v138_v22 = vadd.f32 %v137_v18, %v136_v14  ;;  %720 = vmatprep.subr.bf16.mxu1 %v962_v38  ;;  %v369_v10 = vld [vmem:[#allocation12 + $0x28] sm:$0xff]  ;;  %v370_v12 = vld [vmem:[#allocation12 + $0x30] sm:$0xff]  ;;  %v371_v13 = vld [vmem:[#allocation12 + $0x38] sm:$0xff]  ;;  %s558_s27 = sshll.u32 %s966_s25, 4  ;;  %s559_s27 = int_to_ptr.vmem [resolvable:$true] %s558_s27 }
  0x77   :  { %v153_v23 = vadd.f32 %v152_v19, %v151_v15  ;;  %v160_v24 = vadd.f32 %v159_v20, %v158_v16  ;;  %v730_v11 = vpack.c.bf16 %v369_v10, %v368_v9  ;;  %v733_v14 = vpack.c.bf16 %v371_v13, %v370_v12  ;;  %v372_v15 = vld [vmem:[#allocation12 + $0x40] sm:$0xff]  ;;  %v373_v16 = vld [vmem:[#allocation12 + $0x48] sm:$0xff]  ;;  %v374_v18 = vld [vmem:[#allocation12 + $0x50] sm:$0xff]  ;;  %s919_s28 = scalar_lea.vmem %s559_s27, 32  ;;  %p924_p7 = scmp.lt.s32.totalorder %s559_s27, %s559_s27 }
  0x78   :  { %v132_v25 = vrot.slane %v131_v21, 1  ;;  %v139_v26 = vrot.slane %v138_v22, 1  ;;  %716 = vmatpush3.bf16.msra.mxu0 %v715_v49  ;;  %v736_v17 = vpack.c.bf16 %v373_v16, %v372_v15  ;;  %v375_v19 = vld [vmem:[#allocation12 + $0x58] sm:$0xff]  ;;  %v376_v20 = vld [vmem:[#allocation12 + $0x60] sm:$0xff]  ;;  %v463_v33 = vld [vmem:[#allocation13 + $0x28] sm:$0xff]  ;;  %p920_p6 = scmp.ne.s32.totalorder %s559_s27, %s919_s28  ;;  %p925_p8 = scmp.lt.s32.totalorder %s919_s28, %s919_s28 }
  0x79   :  { %v154_v28 = vrot.slane %v153_v23, 1  ;;  %v161_v29 = vrot.slane %v160_v24, 1  ;;  %722 = vmatpush3.bf16.msra.mxu1 %v721_v51  ;;  %723 = vmatprep.subr.bf16.mxu0 %v962_v38  ;;  %v462_v32 = vld [vmem:[#allocation13 + $0x20] sm:$0xff]  ;;  %v467_v40 = vld [vmem:[#allocation13 + $0x48] sm:$0xff]  ;;  %v468_v42 = vld [vmem:[#allocation13 + $0x50] sm:$0xff] }
  0x7a   :  { %v133_v30 = vadd.f32 %v132_v25, %v131_v21  ;;  %v140_v31 = vadd.f32 %v139_v26, %v138_v22  ;;  %747 = vmatprep.subr.bf16.mxu1 %v962_v38  ;;  %v377_v21 = vld [vmem:[#allocation12 + $0x68] sm:$0xff]  ;;  %v458_v26 = vld [vmem:[#allocation13] sm:$0xff]  ;;  %v754_v34 = vpack.c.bf16 %v463_v33, %v462_v32  ;;  %v572_v50 = vld [vmem:[%s1166_s4] ss:$0 sm:$0xff]  ;;  %p926_p9 = por %p925_p8, %p924_p7 }
  0x7b   :  { %v155_v36 = vadd.f32 %v154_v28, %v153_v23  ;;  %v162_v37 = vadd.f32 %v161_v29, %v160_v24  ;;  %v742_v22 = vpack.c.bf16 %v377_v21, %v376_v20  ;;  %v378_v23 = vld [vmem:[#allocation12 + $0x70] sm:$0xff]  ;;  %v379_v24 = vld [vmem:[#allocation12 + $0x78] sm:$0xff]  ;;  %v466_v39 = vld [vmem:[#allocation13 + $0x40] sm:$0xff] }
  0x7c   :  { %v144_v41 = vsel %vm143_vm1, %v140_v31, %v133_v30  ;;  %v745_v25 = vpack.c.bf16 %v379_v24, %v378_v23  ;;  %v460_v28 = vld [vmem:[#allocation13 + $0x10] sm:$0xff]  ;;  %v461_v30 = vld [vmem:[#allocation13 + $0x18] sm:$0xff]  ;;  %v471_v46 = vld [vmem:[#allocation13 + $0x68] sm:$0xff]  ;;  %p927_p10 = pnand %p926_p9, %p920_p6 }
  0x7d   :  { %v146_v43 = vadd.f32 %v144_v41, %v125_v27  ;;  %v165_v44 = vsel %vm143_vm1, %v162_v37, %v155_v36  ;;  %v459_v27 = vld [vmem:[#allocation13 + $0x8] sm:$0xff]  ;;  %v751_v31 = vpack.c.bf16 %v461_v30, %v460_v28  ;;  %v465_v36 = vld [vmem:[#allocation13 + $0x38] sm:$0xff]  ;;  %v760_v41 = vpack.c.bf16 %v467_v40, %v466_v39 }
  0x7e   :  { %v167_v45 = vadd.f32 %v165_v44, %v148_v35  ;;  %v748_v29 = vpack.c.bf16 %v459_v27, %v458_v26  ;;  %v464_v35 = vld [vmem:[#allocation13 + $0x30] sm:$0xff] }
  0x7f   :  { %147 = vst [vmem:[#allocation2] sm:$0x3] %v146_v43  ;;  %v757_v37 = vpack.c.bf16 %v465_v36, %v464_v35  ;;  %v469_v43 = vld [vmem:[#allocation13 + $0x58] sm:$0xff] }
  0x80   :  { %168 = vst [vmem:[#allocation3] sm:$0x3] %v167_v45  ;;  %v763_v44 = vpack.c.bf16 %v469_v43, %v468_v42  ;;  %v470_v45 = vld [vmem:[#allocation13 + $0x60] sm:$0xff] }
  0x81   :  { %v766_v47 = vpack.c.bf16 %v471_v46, %v470_v45 }
  0x86   :  { %v172_v52 = vld [vmem:[#allocation2] sm:$0x3] }
  0x87   :  { %184 = vrot.lane.b32.xlu1 %v172_v52, %s964_s7  ;;  %175 = vrot.lane.b32.xlu0 %v172_v52, %s965_s10  ;;  %v173_v53 = vld [vmem:[#allocation3] sm:$0x3] }
  0x8b   :  { %188 = vrot.lane.b32.xlu1 %v173_v53, %s964_s7  ;;  %180 = vrot.lane.b32.xlu0 %v173_v53, %s965_s10 }
  0x8f   :  { %196 = vrot.lane.b32.xlu1 %v173_v53, %s952_s19  ;;  %192 = vrot.lane.b32.xlu0 %v172_v52, %s952_s19 }
  0xf9   :  { %v185_v54 = vpop.permute.xlu1 %184  ;;  %v176_v55 = vpop.permute.xlu0 %175 }
  0xfa   :  { %v178_v56 = vadd.f32 %v176_v55, %v172_v52 }
  0xfc   :  { %v187_v63 = vadd.f32 %v185_v54, %v178_v56  ;;  %v472_v56 = vld [vmem:[#allocation13 + $0x70] sm:$0xff] }
  0xfd   :  { %v189_v57 = vpop.permute.xlu1 %188  ;;  %v181_v58 = vpop.permute.xlu0 %180 }
  0xfe   :  { %v183_v59 = vadd.f32 %v181_v58, %v173_v53 }
 0x100   :  { %v191_v62 = vadd.f32 %v189_v57, %v183_v59  ;;  %v473_v57 = vld [vmem:[#allocation13 + $0x78] sm:$0xff] }
 0x101   :  { %v197_v1 = vpop.permute.xlu1 %196  ;;  %v193_v2 = vpop.permute.xlu0 %192  ;;  %v769_v58 = vpack.c.bf16 %v473_v57, %v472_v56 }
 0x102   :  { %v199_v4 = vadd.f32 %v197_v1, %v191_v62  ;;  %v195_v5 = vadd.f32 %v193_v2, %v187_v63  ;;  %v574_v63 = vld [vmem:[%s1170_s8] ss:$0 sm:$0xff] }
 0x104   :  { %628 = vmatmul.mubr.msk.f32.vlgmr.msra.gmra.mrb[0].mxu0 %vm208_vm3, %v199_v4  ;;  %639 = vmatmul.mubr.msk.f32.vlgmr.msra.gmra.mrb[0].mxu1 %vm208_vm3, %v195_v5 }
 0x105   :  { %725 = vmatpush3.bf16.msra.mxu0 %v724_v3  ;;  %673 = vmatprep.mubr.msk.f32.mxu0 %vm963_vm2, %v961_v0 }
 0x106   :  { %726 = vmatprep.subr.bf16.mxu0 %v962_v38  ;;  %708 = vmatprep.mubr.msk.f32.mxu1 %vm963_vm2, %v961_v0  ;;  %v739_v0 = vpack.c.bf16 %v375_v19, %v374_v18 }
 0x107   :  { %749 = vmatpush3.bf16.msra.mxu1 %v748_v29 }
 0x108   :  { %750 = vmatprep.subr.bf16.mxu1 %v962_v38 }
 0x109   :  { %728 = vmatpush3.bf16.msra.mxu0 %v727_v8 }
 0x10a   :  { %729 = vmatprep.subr.bf16.mxu0 %v962_v38 }
 0x10b   :  { %752 = vmatpush3.bf16.msra.mxu1 %v751_v31 }
 0x10c   :  { %753 = vmatprep.subr.bf16.mxu1 %v962_v38 }
 0x10d   :  { %731 = vmatpush3.bf16.msra.mxu0 %v730_v11 }
 0x10e   :  { %732 = vmatprep.subr.bf16.mxu0 %v962_v38 }
 0x10f   :  { %755 = vmatpush3.bf16.msra.mxu1 %v754_v34 }
 0x110   :  { %756 = vmatprep.subr.bf16.mxu1 %v962_v38 }
 0x111   :  { %734 = vmatpush3.bf16.msra.mxu0 %v733_v14 }
 0x112   :  { %735 = vmatprep.subr.bf16.mxu0 %v962_v38 }
 0x113   :  { %758 = vmatpush3.bf16.msra.mxu1 %v757_v37 }
 0x114   :  { %759 = vmatprep.subr.bf16.mxu1 %v962_v38 }
 0x115   :  { %737 = vmatpush3.bf16.msra.mxu0 %v736_v17 }
 0x116   :  { %738 = vmatprep.subr.bf16.mxu0 %v962_v38 }
 0x117   :  { %761 = vmatpush3.bf16.msra.mxu1 %v760_v41 }
 0x118   :  { %762 = vmatprep.subr.bf16.mxu1 %v962_v38 }
 0x119   :  { %740 = vmatpush3.bf16.msra.mxu0 %v739_v0 }
 0x11a   :  { %741 = vmatprep.subr.bf16.mxu0 %v962_v38 }
 0x11b   :  { %764 = vmatpush3.bf16.msra.mxu1 %v763_v44 }
 0x11c   :  { %765 = vmatprep.subr.bf16.mxu1 %v962_v38 }
 0x11d   :  { %743 = vmatpush3.bf16.msra.mxu0 %v742_v22 }
 0x11e   :  { %744 = vmatprep.subr.bf16.mxu0 %v962_v38 }
 0x11f   :  { %767 = vmatpush3.bf16.msra.mxu1 %v766_v47 }
 0x120   :  { %768 = vmatprep.subr.bf16.mxu1 %v962_v38  ;;  %v573_v38 = vld [vmem:[%s1168_s6] ss:$0 sm:$0xff] }
 0x121   :  { %746 = vmatpush3.bf16.msra.mxu0 %v745_v25 }
 0x123   :  { %770 = vmatpush3.bf16.msra.mxu1 %v769_v58 }
 0x1d7   :  { %v278_v48 = vpop.f32.mrb[0].mxu0  ;;  %v351_v49 = vpop.f32.mrb[0].mxu1 }
 0x1d8   :  { %v352_v51 = vadd.f32 %v351_v49, %v278_v48  ;;  %v629_v52 = vpop.f32.mrb[1].mxu0  ;;  %v640_v53 = vpop.f32.mrb[1].mxu1 }
 0x1da   :  { %v362_v54 = vadd.f32 %v572_v50, %v352_v51 }
 0x1dc   :  { %v363_v55 = vmax.f32 %v362_v54, 0.0 }
 0x1de   :  { %674 = vmatmul.mubr.f32.vlgmr.msra.gmra.mrb[2].mxu0 %v363_v55 }
 0x2b1   :  { %v453_v59 = vpop.f32.mrb[2].mxu0 }
 0x2b2   :  { %v454_v60 = vadd.f32 %v573_v38, %v453_v59  ;;  %v675_v61 = vpop.f32.mrb[3].mxu0 }
 0x2b4   :  { %v457_v62 = vmax.f32 %v454_v60, 0.0 }
 0x2b6   :  { %709 = vmatmul.mubr.f32.vlgmr.msra.gmra.mrb[2].mxu1 %v457_v62 }
 0x389   :  { %v547_v1 = vpop.f32.mrb[2].mxu1 }
 0x38a   :  { %v548_v2 = vadd.f32 %v574_v63, %v547_v1  ;;  %v710_v3 = vpop.f32.mrb[3].mxu1 }
 0x38c   :  { %551 = vst [vmem:[#allocation15] sm:$0x3] %v548_v2 }
 0x38d   :  { %930 = shalt.err (!%p927_p10)
}
 0x38e   :  { %s931_s24 = scalar_lea.hbm %s1171_s9, 32 }
 0x38f   :  { %p932_p11 = scmp.ne.s32.totalorder %s1171_s9, %s931_s24  ;;  %p935_p12 = scmp.lt.u32.totalorder %s931_s24, %s1171_s9 }
 0x391   :  { %p937_p13 = pnand %p935_p12, %p932_p11 }
 0x393   :  { %940 = shalt.err (!%p937_p13)
}
 0x394   :  { %561 = dma.vmem_to_hbm [thread:$0]  %s559_s27, 32, %s1171_s9, [#allocation6]  }
 0x395   :  { %949 = dma.done.wait [#allocation6], 32  }
 0x396   :  { %950 = vsyncadd [#allocation6], 4294967264 }
 0x397   :  { %565 = vsyncpa [#allocation5], 1 }
 0x398   :  { %566 = vsyncpa [#allocation8], 1 }
 0x399   :  { %567 = vsyncpa [#allocation11], 1 }
 0x39a   :  { %568 = vsyncpa [#allocation14], 1 }
 0x39b   :  { %569 = vsyncpa [#allocation6], 1 }

</bundles_post_ra>
